<compile_context>
chip_gen: v5e
topology: v5e:2x2
jax: 0.10.0
libtpu: 0.0.40
codegen_flags: <defaults>
</compile_context>

<pallas_src>
import functools
import math

import jax
import jax.numpy as jnp
from jax.experimental import pallas as pl
from jax.experimental.pallas import tpu as pltpu


# ------------------------- generation-dependent config -----------------------


def _vmem_capacity_bytes():
    try:
        info = pltpu.get_tpu_info()
        for attr in ("vmem_capacity_bytes", "vmem_bytes", "vmem_size_bytes"):
            v = getattr(info, attr, None)
            if v:
                return int(v)
    except Exception:
        pass
    return 128 * 1024 * 1024


_VMEM_CAP = _vmem_capacity_bytes()
# v7x: 64 MiB/TC -> cap at 48 MiB (headroom for compiler scratch);
# v5e/v6e: 128 MiB -> ~96 MiB.
_VMEM_LIMIT = min((_VMEM_CAP * 3) // 4, 112 * 1024 * 1024)
# Smaller query tiles on v7x keep resident K/V + double-buffered (tq,L) outputs
# inside the smaller VMEM.
_TQ_TARGET = 128 if _VMEM_CAP <= 64 * 1024 * 1024 else 256
_TKV_TARGET = 512


def _pick_tile(dim, target, align, min_steps=1):
    """Largest tile <= target that divides `dim` and is a multiple of `align`.
    With min_steps>1, also caps the tile so the axis gets >= min_steps grid
    steps (megacore sharding on v7x).  Falls back to the full dim when nothing
    divides (a full-extent block is always legal).
    TODO(synk): replace the full-dim fallback with pl.cdiv grids + masked tails
    so a non-divisible large dim cannot silently blow the VMEM budget."""
    if min_steps > 1 and dim >= align * min_steps:
        target = min(target, max(align, ((dim // min_steps) // align) * align))
    if dim <= target:
        return dim
    t = (target // align) * align
    while t >= align:
        if dim % t == 0:
            return t
        t -= align
    return dim


# --------------------------- fused QKV projection ----------------------------


def _matmul_bias_kernel(x_ref, w_ref, b_ref, o_ref, acc_ref):
    k = pl.program_id(2)

    @pl.when(k == 0)
    def _():
        acc_ref[...] = jnp.zeros_like(acc_ref)

    acc_ref[...] += jnp.dot(x_ref[...], w_ref[...],
                            preferred_element_type=jnp.float32)

    @pl.when(k == pl.num_programs(2) - 1)
    def _():
        o_ref[...] = (acc_ref[...] + b_ref[...]).astype(o_ref.dtype)


def matmul_bias(x, w, b, *, tm=512, tn=512, tk=1024):
    M, K = x.shape
    _, N = w.shape
    tm = _pick_tile(M, tm, 16, min_steps=2)   # >=2 row steps -> both v7x TCs
    tn = _pick_tile(N, tn, 128)
    tk = _pick_tile(K, tk, 128)
    gm, gn, gk = M // tm, N // tn, K // tk
    # Weight-streaming-bound regime (few row tiles, many K tiles): deepen the
    # weight pipeline so the HBM fetch hides behind the matmuls.
    if gm <= 2 and gk >= 3:
        w_spec = pl.BlockSpec((tk, tn), lambda i, j, k: (k, j),
                              pipeline_mode=pl.Buffered(3))
    else:
        w_spec = pl.BlockSpec((tk, tn), lambda i, j, k: (k, j))
    return pl.pallas_call(
        _matmul_bias_kernel,
        out_shape=jax.ShapeDtypeStruct((M, N), x.dtype),
        grid=(gm, gn, gk),
        in_specs=[
            pl.BlockSpec((tm, tk), lambda i, j, k: (i, k)),
            w_spec,
            pl.BlockSpec((1, tn), lambda i, j, k: (0, j)),
        ],
        out_specs=pl.BlockSpec((tm, tn), lambda i, j, k: (i, j)),
        scratch_shapes=[pltpu.VMEM((tm, tn), jnp.float32)],
        compiler_params=pltpu.CompilerParams(
            dimension_semantics=("parallel", "parallel", "arbitrary"),
            vmem_limit_bytes=_VMEM_LIMIT,
        ),
    )(x, w, b.reshape(1, N))


# ------------------- attention (map-producing path, head-major) --------------


def _attn_probs_kernel(q_ref, k_ref, v_ref, o_ref, a_ref, *, scale):
    # q_ref: (1,1,tq,dh); k_ref/v_ref: (1,1,L,dh); o_ref: (1,1,tq,dh); a_ref: (1,1,tq,L)
    q = q_ref[0, 0] * scale          # fold 1/sqrt(dh) into q
    k = k_ref[0, 0]
    v = v_ref[0, 0]
    s = jax.lax.dot_general(q, k, (((1,), (1,)), ((), ())),
                            preferred_element_type=jnp.float32)
    s = s - jnp.max(s, axis=-1, keepdims=True)
    e = jnp.exp(s)
    p = e / jnp.sum(e, axis=-1, keepdims=True)   # exact: the probs are returned
    a_ref[0, 0] = p.astype(a_ref.dtype)
    o_ref[0, 0] = jnp.dot(p.astype(v.dtype), v,
                          preferred_element_type=jnp.float32).astype(o_ref.dtype)


def attention_with_probs(q, k, v, *, attn_dtype=jnp.float32):
    """q, k, v: head-major (B, H, L, dh). Returns ctx (B,H,L,dh), A (B,H,L,L)."""
    B, H, L, dh = q.shape
    scale = 1.0 / math.sqrt(dh)
    tq = _pick_tile(L, _TQ_TARGET, 16)
    grid = (B, H, L // tq)
    # NOTE: the (B,H,L,L) probability write is O(L^2) HBM traffic and only exists
    # because the reference module returns the attention maps. When they are not
    # consumed, use flash_attention() below (output_attention=False).
    return pl.pallas_call(
        functools.partial(_attn_probs_kernel, scale=scale),
        out_shape=(
            jax.ShapeDtypeStruct((B, H, L, dh), q.dtype),
            jax.ShapeDtypeStruct((B, H, L, L), attn_dtype),
        ),
        grid=grid,
        in_specs=[
            pl.BlockSpec((1, 1, tq, dh), lambda b, h, qi: (b, h, qi, 0)),  # Q rows
            pl.BlockSpec((1, 1, L, dh), lambda b, h, qi: (b, h, 0, 0)),    # K (resident)
            pl.BlockSpec((1, 1, L, dh), lambda b, h, qi: (b, h, 0, 0)),    # V (resident)
        ],
        out_specs=(
            pl.BlockSpec((1, 1, tq, dh), lambda b, h, qi: (b, h, qi, 0)),
            pl.BlockSpec((1, 1, tq, L), lambda b, h, qi: (b, h, qi, 0)),
        ),
        compiler_params=pltpu.CompilerParams(
            dimension_semantics=("parallel", "parallel", "parallel"),
            vmem_limit_bytes=_VMEM_LIMIT,
        ),
    )(q, k, v)


# ----------------- attention (flash / online-softmax, no maps) ---------------


def _flash_kernel(q_ref, k_ref, v_ref, o_ref, m_sc, l_sc, acc_sc, *, scale):
    kv = pl.program_id(3)

    @pl.when(kv == 0)
    def _():
        m_sc[...] = jnp.full_like(m_sc, -jnp.inf)
        l_sc[...] = jnp.zeros_like(l_sc)
        acc_sc[...] = jnp.zeros_like(acc_sc)

    q = q_ref[0, 0] * scale
    k = k_ref[0, 0]
    v = v_ref[0, 0]
    s = jax.lax.dot_general(q, k, (((1,), (1,)), ((), ())),
                            preferred_element_type=jnp.float32)
    m_new = jnp.maximum(m_sc[...], jnp.max(s, axis=-1, keepdims=True))
    alpha = jnp.exp(m_sc[...] - m_new)
    p = jnp.exp(s - m_new)
    l_sc[...] = alpha * l_sc[...] + jnp.sum(p, axis=-1, keepdims=True)
    acc_sc[...] = alpha * acc_sc[...] + jnp.dot(p.astype(v.dtype), v,
                                                preferred_element_type=jnp.float32)
    m_sc[...] = m_new

    @pl.when(kv == pl.num_programs(3) - 1)
    def _():
        o_ref[0, 0] = (acc_sc[...] *
                       pl.reciprocal(l_sc[...], approx=True)).astype(o_ref.dtype)


def flash_attention(q, k, v):
    """q, k, v: head-major (B, H, L, dh). Returns ctx (B,H,L,dh); no (L,L) maps."""
    B, H, L, dh = q.shape
    scale = 1.0 / math.sqrt(dh)
    tq = _pick_tile(L, _TQ_TARGET, 16)
    tkv = _pick_tile(L, _TKV_TARGET, 16)
    grid = (B, H, L // tq, L // tkv)
    return pl.pallas_call(
        functools.partial(_flash_kernel, scale=scale),
        out_shape=jax.ShapeDtypeStruct((B, H, L, dh), q.dtype),
        grid=grid,
        in_specs=[
            pl.BlockSpec((1, 1, tq, dh), lambda b, h, qi, ki: (b, h, qi, 0)),
            pl.BlockSpec((1, 1, tkv, dh), lambda b, h, qi, ki: (b, h, ki, 0)),
            pl.BlockSpec((1, 1, tkv, dh), lambda b, h, qi, ki: (b, h, ki, 0)),
        ],
        out_specs=pl.BlockSpec((1, 1, tq, dh), lambda b, h, qi, ki: (b, h, qi, 0)),
        scratch_shapes=[
            pltpu.VMEM((tq, 1), jnp.float32),    # running max
            pltpu.VMEM((tq, 1), jnp.float32),    # running denom
            pltpu.VMEM((tq, dh), jnp.float32),   # running context
        ],
        compiler_params=pltpu.CompilerParams(
            dimension_semantics=("parallel", "parallel", "parallel", "arbitrary"),
            vmem_limit_bytes=_VMEM_LIMIT,
        ),
    )(q, k, v)


# --------------- output projection + residual + LayerNorm (fused) ------------


def _proj_res_ln_kernel(x_ref, w_ref, b_ref, res_ref, g_ref, be_ref, o_ref,
                        acc_ref, *, eps):
    k = pl.program_id(1)

    @pl.when(k == 0)
    def _():
        acc_ref[...] = jnp.zeros_like(acc_ref)

    acc_ref[...] += jnp.dot(x_ref[...], w_ref[...],
                            preferred_element_type=jnp.float32)

    @pl.when(k == pl.num_programs(1) - 1)
    def _():
        z = acc_ref[...] + b_ref[...] + res_ref[...].astype(jnp.float32)
        mu = jnp.mean(z, axis=-1, keepdims=True)
        var = jnp.mean((z - mu) * (z - mu), axis=-1, keepdims=True)
        zn = (z - mu) * jax.lax.rsqrt(var + eps)
        o_ref[...] = (zn * g_ref[...] + be_ref[...]).astype(o_ref.dtype)


def proj_res_ln(x, w, b, res, gamma, beta, *, eps=1e-5, tm=512, tk=512):
    M, K = x.shape
    _, N = w.shape  # N == d_model (full feature axis stays in the block for LN)
    tm = _pick_tile(M, tm, 16, min_steps=2)
    tk = _pick_tile(K, tk, 128)
    grid = (M // tm, K // tk)
    return pl.pallas_call(
        functools.partial(_proj_res_ln_kernel, eps=eps),
        out_shape=jax.ShapeDtypeStruct((M, N), x.dtype),
        grid=grid,
        in_specs=[
            pl.BlockSpec((tm, tk), lambda i, k: (i, k)),   # ctx
            pl.BlockSpec((tk, N), lambda i, k: (k, 0)),    # Wo
            pl.BlockSpec((1, N), lambda i, k: (0, 0)),     # bo
            pl.BlockSpec((tm, N), lambda i, k: (i, 0)),    # residual
            pl.BlockSpec((1, N), lambda i, k: (0, 0)),     # gamma
            pl.BlockSpec((1, N), lambda i, k: (0, 0)),     # beta
        ],
        out_specs=pl.BlockSpec((tm, N), lambda i, k: (i, 0)),
        scratch_shapes=[pltpu.VMEM((tm, N), jnp.float32)],
        compiler_params=pltpu.CompilerParams(
            dimension_semantics=("parallel", "arbitrary"),
            vmem_limit_bytes=_VMEM_LIMIT,
        ),
    )(x, w, b.reshape(1, N), res, gamma.reshape(1, N), beta.reshape(1, N))


# --------------- fused FFN (W1 -> relu -> W2) + residual + LayerNorm ---------


def _ffn_res_ln_kernel(x_ref, w1_ref, b1_ref, w2_ref, b2_ref, g_ref, be_ref,
                       o_ref, acc_ref, *, eps):
    f = pl.program_id(1)

    @pl.when(f == 0)
    def _():
        acc_ref[...] = jnp.zeros_like(acc_ref)

    # relu(x @ W1[:, f-tile] + b1[f-tile]) @ W2[f-tile, :]; the d_ff intermediate
    # never leaves VMEM.  (bf16 recast of the intermediate keeps MXU throughput;
    # the whole model is bf16 activations with f32 accumulation.)
    h = jnp.dot(x_ref[...], w1_ref[...],
                preferred_element_type=jnp.float32) + b1_ref[...]
    h = jnp.maximum(h, 0.0)
    acc_ref[...] += jnp.dot(h.astype(w2_ref.dtype), w2_ref[...],
                            preferred_element_type=jnp.float32)

    @pl.when(f == pl.num_programs(1) - 1)
    def _():
        z = acc_ref[...] + b2_ref[...] + x_ref[...].astype(jnp.float32)
        mu = jnp.mean(z, axis=-1, keepdims=True)
        var = jnp.mean((z - mu) * (z - mu), axis=-1, keepdims=True)
        zn = (z - mu) * jax.lax.rsqrt(var + eps)
        o_ref[...] = (zn * g_ref[...] + be_ref[...]).astype(o_ref.dtype)


def ffn_res_ln(x, w1, b1, w2, b2, gamma, beta, *, eps=1e-5, tm=256, tf=256):
    M, D = x.shape
    _, F = w1.shape
    tm = _pick_tile(M, tm, 16, min_steps=2)
    tf = _pick_tile(F, tf, 128)
    gm, gf = M // tm, F // tf
    if gm <= 2 and gf >= 3:   # weight-streaming-bound: deepen W1/W2 pipelines
        w1_spec = pl.BlockSpec((D, tf), lambda i, f: (0, f),
                               pipeline_mode=pl.Buffered(3))
        w2_spec = pl.BlockSpec((tf, D), lambda i, f: (f, 0),
                               pipeline_mode=pl.Buffered(3))
    else:
        w1_spec = pl.BlockSpec((D, tf), lambda i, f: (0, f))
        w2_spec = pl.BlockSpec((tf, D), lambda i, f: (f, 0))
    return pl.pallas_call(
        functools.partial(_ffn_res_ln_kernel, eps=eps),
        out_shape=jax.ShapeDtypeStruct((M, D), x.dtype),
        grid=(gm, gf),
        in_specs=[
            pl.BlockSpec((tm, D), lambda i, f: (i, 0)),   # x (FFN input + residual)
            w1_spec,                                      # W1 tile
            pl.BlockSpec((1, tf), lambda i, f: (0, f)),   # b1 tile
            w2_spec,                                      # W2 tile
            pl.BlockSpec((1, D), lambda i, f: (0, 0)),    # b2
            pl.BlockSpec((1, D), lambda i, f: (0, 0)),    # gamma
            pl.BlockSpec((1, D), lambda i, f: (0, 0)),    # beta
        ],
        out_specs=pl.BlockSpec((tm, D), lambda i, f: (i, 0)),
        scratch_shapes=[pltpu.VMEM((tm, D), jnp.float32)],
        compiler_params=pltpu.CompilerParams(
            dimension_semantics=("parallel", "arbitrary"),
            vmem_limit_bytes=_VMEM_LIMIT,
        ),
    )(x, w1, b1.reshape(1, F), w2, b2.reshape(1, D),
      gamma.reshape(1, D), beta.reshape(1, D))


# ------------------------------- encoder glue --------------------------------


def init_layer_params(key, d_model, d_ff, n_heads, dtype=jnp.bfloat16):
    ks = jax.random.split(key, 6)
    s = 0.02
    wq = s * jax.random.normal(ks[0], (d_model, d_model), jnp.float32)
    wk = s * jax.random.normal(ks[1], (d_model, d_model), jnp.float32)
    wv = s * jax.random.normal(ks[2], (d_model, d_model), jnp.float32)
    return {
        # fused Q/K/V projection weight (D, 3D); per-head dh chunks are contiguous
        "Wqkv": jnp.concatenate([wq, wk, wv], axis=1).astype(dtype),
        "bqkv": jnp.zeros((3 * d_model,), jnp.float32),
        "Wo": (s * jax.random.normal(ks[3], (d_model, d_model), jnp.float32)).astype(dtype),
        "bo": jnp.zeros((d_model,), jnp.float32),
        # FFN: Conv1d(d_model, d_ff, 1) / Conv1d(d_ff, d_model, 1) == per-position linears
        "W1": (s * jax.random.normal(ks[4], (d_model, d_ff), jnp.float32)).astype(dtype),
        "b1": jnp.zeros((d_ff,), jnp.float32),
        "W2": (s * jax.random.normal(ks[5], (d_ff, d_model), jnp.float32)).astype(dtype),
        "b2": jnp.zeros((d_model,), jnp.float32),
        "g1": jnp.ones((d_model,), jnp.float32),
        "be1": jnp.zeros((d_model,), jnp.float32),
        "g2": jnp.ones((d_model,), jnp.float32),
        "be2": jnp.zeros((d_model,), jnp.float32),
    }


def encoder_layer(x, p, *, n_heads, eps=1e-5, output_attention=True):
    # x: (B, L, D). Dropout is identity (eval); attn_mask/tau/delta are None.
    B, L, D = x.shape
    M = B * L
    dh = D // n_heads
    x2d = x.reshape(M, D)

    qkv = matmul_bias(x2d, p["Wqkv"], p["bqkv"])                 # (M, 3D)

    # Head-major re-layout (3, B, H, L, dh): every per-head block handed to the
    # attention kernels is a whole lane-aligned array slice, so the kernels do
    # no in-kernel lane slicing and never DMA the fused 3D width.
    qkvh = qkv.reshape(B, L, 3, n_heads, dh).transpose(2, 0, 3, 1, 4)
    q, k, v = qkvh[0], qkvh[1], qkvh[2]

    if output_attention:
        ctx, attn = attention_with_probs(q, k, v)                # maps returned (module semantics)
    else:
        ctx = flash_attention(q, k, v)                           # no O(L^2) map write
        attn = None

    ctx2d = ctx.transpose(0, 2, 1, 3).reshape(M, D)              # back to (M, D), head-concat order

    # Wo projection + residual + LayerNorm1 (fused epilogue)
    x1 = proj_res_ln(ctx2d, p["Wo"], p["bo"], x2d, p["g1"], p["be1"], eps=eps)

    # FFN (W1 -> relu -> W2) + residual + LayerNorm2 (single fused kernel)
    x2 = ffn_res_ln(x1, p["W1"], p["b1"], p["W2"], p["b2"],
                    p["g2"], p["be2"], eps=eps)

    return x2.reshape(B, L, D), attn


def ts_encoder(x, layer_params, *, n_heads, eps=1e-5, output_attention=True):
    # TSEncoder.forward: run every attn layer, collect attention maps.
    attns = []
    for p in layer_params:
        x, a = encoder_layer(x, p, n_heads=n_heads, eps=eps,
                             output_attention=output_attention)
        attns.append(a)
    return x, attns


# ---------------------------------- main --------------------------------------


if __name__ == "__main__":
    B, L, d_model, n_heads, d_ff, n_layers = 2, 8, 32, 4, 64, 2
    dtype = jnp.bfloat16  # bf16 activations/weights, f32 accumulation inside kernels

    key = jax.random.PRNGKey(0)
    key_x, *layer_keys = jax.random.split(key, n_layers + 1)

    x = jax.random.normal(key_x, (B, L, d_model), jnp.float32).astype(dtype)
    layer_params = [init_layer_params(k, d_model, d_ff, n_heads, dtype)
                    for k in layer_keys]

    # Reference path: matches the PyTorch module (attention maps returned).
    fwd = jax.jit(functools.partial(ts_encoder, n_heads=n_heads))
    out, attns = fwd(x, layer_params)
    out = jax.block_until_ready(out)
    attns = [jax.block_until_ready(a) for a in attns]

    assert out.shape == (B, L, d_model)
    assert all(a.shape == (B, n_heads, L, L) for a in attns)
    assert all(a.dtype == jnp.float32 for a in attns)
    # exact softmax on the map path -> rows sum to 1
    assert bool(jnp.allclose(attns[0].sum(-1), 1.0, atol=1e-3))

    # Flash / online-softmax path (no O(L^2) map write); contexts must agree.
    fwd_flash = jax.jit(functools.partial(ts_encoder, n_heads=n_heads,
                                          output_attention=False))
    out_flash, attns_flash = fwd_flash(x, layer_params)
    out_flash = jax.block_until_ready(out_flash)
    assert all(a is None for a in attns_flash)
    assert bool(jnp.allclose(out.astype(jnp.float32),
                             out_flash.astype(jnp.float32),
                             atol=5e-2, rtol=5e-2))

    print("KERNEL_OK")
</pallas_src>

<mosaic_0001>
module attributes {stable_mosaic.version = 11 : i64} {
  func.func @_matmul_bias_kernel(%arg0: i32, %arg1: i32, %arg2: i32, %arg3: memref<16x32xbf16, #tpu.memory_space<vmem>>, %arg4: memref<32x96xbf16, #tpu.memory_space<vmem>>, %arg5: memref<1x96xf32, #tpu.memory_space<vmem>>, %arg6: memref<16x96xbf16, #tpu.memory_space<vmem>>, %arg7: memref<16x96xf32, #tpu.memory_space<vmem>>) attributes {dimension_semantics = [#tpu.dimension_semantics<parallel>, #tpu.dimension_semantics<parallel>, #tpu.dimension_semantics<arbitrary>], iteration_bounds = array<i64: 1, 1, 1>, scalar_prefetch = 0 : i64, scratch_operands = 1 : i64, tpu.core_type = #tpu.core_type<tc>, window_params = [{transform_indices = @transform_0, window_bounds = array<i64: 16, 32>}, {transform_indices = @transform_1, window_bounds = array<i64: 32, 96>}, {transform_indices = @transform_2, window_bounds = array<i64: 1, 96>}, {transform_indices = @transform_3, window_bounds = array<i64: 16, 96>}]} {
    %c0_i32 = arith.constant 0 : i32
    %0 = arith.cmpi eq, %arg2, %c0_i32 : i32
    %1 = arith.extui %0 : i1 to i32
    %c0_i32_0 = arith.constant 0 : i32
    %2 = arith.cmpi ne, %1, %c0_i32_0 : i32
    scf.if %2 {
      %cst_10 = arith.constant 0.000000e+00 : f32
      %12 = vector.broadcast %cst_10 : f32 to vector<16x96xf32>
      %c0_11 = arith.constant 0 : index
      %c0_12 = arith.constant 0 : index
      %13 = vector.load %arg7[%c0_11, %c0_12] : memref<16x96xf32, #tpu.memory_space<vmem>>, vector<16x96xf32>
      tpu.vector_store %arg7[%c0_11, %c0_12], %12 {strides = array<i32>} : memref<16x96xf32, #tpu.memory_space<vmem>>, vector<16x96xf32>,
    } else {
    }
    %c0 = arith.constant 0 : index
    %c0_1 = arith.constant 0 : index
    %3 = vector.load %arg7[%c0, %c0_1] : memref<16x96xf32, #tpu.memory_space<vmem>>, vector<16x96xf32>
    %c0_2 = arith.constant 0 : index
    %c0_3 = arith.constant 0 : index
    %4 = vector.load %arg3[%c0_2, %c0_3] : memref<16x32xbf16, #tpu.memory_space<vmem>>, vector<16x32xbf16>
    %c0_4 = arith.constant 0 : index
    %c0_5 = arith.constant 0 : index
    %5 = vector.load %arg4[%c0_4, %c0_5] : memref<32x96xbf16, #tpu.memory_space<vmem>>, vector<32x96xbf16>
    %cst = arith.constant dense<0.000000e+00> : vector<16x96xf32>
    %6 = tpu.matmul %4, %5, %cst {dimension_numbers = #tpu.dot_dimension_numbers<[1], [0], [0], [1], [0, 0, 1, 1], [], []>} : vector<16x32xbf16>, vector<32x96xbf16>, vector<16x96xf32> -> vector<16x96xf32>
    %7 = arith.addf %3, %6 : vector<16x96xf32>
    %c0_6 = arith.constant 0 : index
    %c0_7 = arith.constant 0 : index
    %8 = vector.load %arg7[%c0_6, %c0_7] : memref<16x96xf32, #tpu.memory_space<vmem>>, vector<16x96xf32>
    tpu.vector_store %arg7[%c0_6, %c0_7], %7 {strides = array<i32>} : memref<16x96xf32, #tpu.memory_space<vmem>>, vector<16x96xf32>,
    %c0_i32_8 = arith.constant 0 : i32
    %9 = arith.cmpi eq, %arg2, %c0_i32_8 : i32
    %10 = arith.extui %9 : i1 to i32
    %c0_i32_9 = arith.constant 0 : i32
    %11 = arith.cmpi ne, %10, %c0_i32_9 : i32
    scf.if %11 {
      %c0_10 = arith.constant 0 : index
      %c0_11 = arith.constant 0 : index
      %12 = vector.load %arg7[%c0_10, %c0_11] : memref<16x96xf32, #tpu.memory_space<vmem>>, vector<16x96xf32>
      %c0_12 = arith.constant 0 : index
      %c0_13 = arith.constant 0 : index
      %13 = vector.load %arg5[%c0_12, %c0_13] : memref<1x96xf32, #tpu.memory_space<vmem>>, vector<1x96xf32>
      %14 = vector.broadcast %13 : vector<1x96xf32> to vector<16x96xf32>
      %15 = arith.addf %12, %14 : vector<16x96xf32>
      %16 = arith.truncf %15 : vector<16x96xf32> to vector<16x96xbf16>
      %c0_14 = arith.constant 0 : index
      %c0_15 = arith.constant 0 : index
      %17 = vector.load %arg6[%c0_14, %c0_15] : memref<16x96xbf16, #tpu.memory_space<vmem>>, vector<16x96xbf16>
      tpu.vector_store %arg6[%c0_14, %c0_15], %16 {strides = array<i32>} : memref<16x96xbf16, #tpu.memory_space<vmem>>, vector<16x96xbf16>,
    } else {
    }
    return
  }
  func.func @transform_0(%arg0: i32, %arg1: i32, %arg2: i32) -> (i32, i32) {
    %c0_i32 = arith.constant 0 : i32
    return %arg0, %arg2 : i32, i32
  }
  func.func @transform_1(%arg0: i32, %arg1: i32, %arg2: i32) -> (i32, i32) {
    %c0_i32 = arith.constant 0 : i32
    return %arg2, %arg1 : i32, i32
  }
  func.func @transform_2(%arg0: i32, %arg1: i32, %arg2: i32) -> (i32, i32) {
    %c0_i32 = arith.constant 0 : i32
    %c0_i32_0 = arith.constant 0 : i32
    return %c0_i32, %arg1 : i32, i32
  }
  func.func @transform_3(%arg0: i32, %arg1: i32, %arg2: i32) -> (i32, i32) {
    %c0_i32 = arith.constant 0 : i32
    return %arg0, %arg1 : i32, i32
  }
}

module attributes {stable_mosaic.version = 11 : i64} {
  func.func @_attn_probs_kernel(%arg0: i32, %arg1: i32, %arg2: i32, %arg3: memref<1x1x8x8xbf16, #tpu.memory_space<vmem>>, %arg4: memref<1x1x8x8xbf16, #tpu.memory_space<vmem>>, %arg5: memref<1x1x8x8xbf16, #tpu.memory_space<vmem>>, %arg6: memref<1x1x8x8xbf16, #tpu.memory_space<vmem>>, %arg7: memref<1x1x8x8xf32, #tpu.memory_space<vmem>>) attributes {dimension_semantics = [#tpu.dimension_semantics<parallel>, #tpu.dimension_semantics<parallel>, #tpu.dimension_semantics<parallel>], iteration_bounds = array<i64: 2, 4, 1>, scalar_prefetch = 0 : i64, scratch_operands = 0 : i64, tpu.core_type = #tpu.core_type<tc>, window_params = [{transform_indices = @transform_0, window_bounds = array<i64: 1, 1, 8, 8>}, {transform_indices = @transform_1, window_bounds = array<i64: 1, 1, 8, 8>}, {transform_indices = @transform_2, window_bounds = array<i64: 1, 1, 8, 8>}, {transform_indices = @transform_3, window_bounds = array<i64: 1, 1, 8, 8>}, {transform_indices = @transform_4, window_bounds = array<i64: 1, 1, 8, 8>}]} {
    %c0 = arith.constant 0 : index
    %c0_0 = arith.constant 0 : index
    %c0_1 = arith.constant 0 : index
    %c0_2 = arith.constant 0 : index
    %0 = vector.load %arg3[%c0, %c0_0, %c0_1, %c0_2] : memref<1x1x8x8xbf16, #tpu.memory_space<vmem>>, vector<1x1x8x8xbf16>
    %1 = vector.shape_cast %0 : vector<1x1x8x8xbf16> to vector<8x8xbf16>
    %cst = arith.constant 3.535160e-01 : bf16
    %2 = vector.broadcast %cst : bf16 to vector<8x8xbf16>
    %3 = arith.mulf %1, %2 : vector<8x8xbf16>
    %c0_3 = arith.constant 0 : index
    %c0_4 = arith.constant 0 : index
    %c0_5 = arith.constant 0 : index
    %c0_6 = arith.constant 0 : index
    %4 = vector.load %arg4[%c0_3, %c0_4, %c0_5, %c0_6] : memref<1x1x8x8xbf16, #tpu.memory_space<vmem>>, vector<1x1x8x8xbf16>
    %5 = vector.shape_cast %4 : vector<1x1x8x8xbf16> to vector<8x8xbf16>
    %c0_7 = arith.constant 0 : index
    %c0_8 = arith.constant 0 : index
    %c0_9 = arith.constant 0 : index
    %c0_10 = arith.constant 0 : index
    %6 = vector.load %arg5[%c0_7, %c0_8, %c0_9, %c0_10] : memref<1x1x8x8xbf16, #tpu.memory_space<vmem>>, vector<1x1x8x8xbf16>
    %7 = vector.shape_cast %6 : vector<1x1x8x8xbf16> to vector<8x8xbf16>
    %cst_11 = arith.constant dense<0.000000e+00> : vector<8x8xf32>
    %8 = tpu.matmul %3, %5, %cst_11 {dimension_numbers = #tpu.dot_dimension_numbers<[1], [1], [0], [0], [0, 0, 1, 0], [], []>} : vector<8x8xbf16>, vector<8x8xbf16>, vector<8x8xf32> -> vector<8x8xf32>
    %cst_12 = arith.constant dense<0xFF800000> : vector<8xf32>
    %9 = vector.multi_reduction <maximumf>, %8, %cst_12 [1] : vector<8x8xf32> to vector<8xf32>
    %10 = vector.shape_cast %9 : vector<8xf32> to vector<8x1xf32>
    %11 = vector.broadcast %10 : vector<8x1xf32> to vector<8x8xf32>
    %12 = arith.subf %8, %11 : vector<8x8xf32>
    %13 = math.exp %12 : vector<8x8xf32>
    %cst_13 = arith.constant dense<0.000000e+00> : vector<8xf32>
    %14 = vector.multi_reduction <add>, %13, %cst_13 [1] : vector<8x8xf32> to vector<8xf32>
    %15 = vector.shape_cast %14 : vector<8xf32> to vector<8x1xf32>
    %16 = vector.broadcast %15 : vector<8x1xf32> to vector<8x8xf32>
    %17 = arith.divf %13, %16 : vector<8x8xf32>
    %c0_14 = arith.constant 0 : index
    %c0_15 = arith.constant 0 : index
    %c0_16 = arith.constant 0 : index
    %c0_17 = arith.constant 0 : index
    %18 = vector.load %arg7[%c0_14, %c0_15, %c0_16, %c0_17] : memref<1x1x8x8xf32, #tpu.memory_space<vmem>>, vector<1x1x8x8xf32>
    %19 = vector.shape_cast %18 : vector<1x1x8x8xf32> to vector<8x8xf32>
    %20 = vector.shape_cast %17 : vector<8x8xf32> to vector<1x1x8x8xf32>
    tpu.vector_store %arg7[%c0_14, %c0_15, %c0_16, %c0_17], %20 {strides = array<i32>} : memref<1x1x8x8xf32, #tpu.memory_space<vmem>>, vector<1x1x8x8xf32>,
    %21 = arith.truncf %17 : vector<8x8xf32> to vector<8x8xbf16>
    %cst_18 = arith.constant dense<0.000000e+00> : vector<8x8xf32>
    %22 = tpu.matmul %21, %7, %cst_18 {dimension_numbers = #tpu.dot_dimension_numbers<[1], [0], [0], [1], [0, 0, 1, 1], [], []>} : vector<8x8xbf16>, vector<8x8xbf16>, vector<8x8xf32> -> vector<8x8xf32>
    %23 = arith.truncf %22 : vector<8x8xf32> to vector<8x8xbf16>
    %c0_19 = arith.constant 0 : index
    %c0_20 = arith.constant 0 : index
    %c0_21 = arith.constant 0 : index
    %c0_22 = arith.constant 0 : index
    %24 = vector.load %arg6[%c0_19, %c0_20, %c0_21, %c0_22] : memref<1x1x8x8xbf16, #tpu.memory_space<vmem>>, vector<1x1x8x8xbf16>
    %25 = vector.shape_cast %24 : vector<1x1x8x8xbf16> to vector<8x8xbf16>
    %26 = vector.shape_cast %23 : vector<8x8xbf16> to vector<1x1x8x8xbf16>
    tpu.vector_store %arg6[%c0_19, %c0_20, %c0_21, %c0_22], %26 {strides = array<i32>} : memref<1x1x8x8xbf16, #tpu.memory_space<vmem>>, vector<1x1x8x8xbf16>,
    return
  }
  func.func @transform_0(%arg0: i32, %arg1: i32, %arg2: i32) -> (i32, i32, i32, i32) {
    %c0_i32 = arith.constant 0 : i32
    %c0_i32_0 = arith.constant 0 : i32
    return %arg0, %arg1, %arg2, %c0_i32 : i32, i32, i32, i32
  }
  func.func @transform_1(%arg0: i32, %arg1: i32, %arg2: i32) -> (i32, i32, i32, i32) {
    %c0_i32 = arith.constant 0 : i32
    %c0_i32_0 = arith.constant 0 : i32
    %c0_i32_1 = arith.constant 0 : i32
    return %arg0, %arg1, %c0_i32, %c0_i32_0 : i32, i32, i32, i32
  }
  func.func @transform_2(%arg0: i32, %arg1: i32, %arg2: i32) -> (i32, i32, i32, i32) {
    %c0_i32 = arith.constant 0 : i32
    %c0_i32_0 = arith.constant 0 : i32
    %c0_i32_1 = arith.constant 0 : i32
    return %arg0, %arg1, %c0_i32, %c0_i32_0 : i32, i32, i32, i32
  }
  func.func @transform_3(%arg0: i32, %arg1: i32, %arg2: i32) -> (i32, i32, i32, i32) {
    %c0_i32 = arith.constant 0 : i32
    %c0_i32_0 = arith.constant 0 : i32
    return %arg0, %arg1, %arg2, %c0_i32 : i32, i32, i32, i32
  }
  func.func @transform_4(%arg0: i32, %arg1: i32, %arg2: i32) -> (i32, i32, i32, i32) {
    %c0_i32 = arith.constant 0 : i32
    %c0_i32_0 = arith.constant 0 : i32
    return %arg0, %arg1, %arg2, %c0_i32 : i32, i32, i32, i32
  }
}

module attributes {stable_mosaic.version = 11 : i64} {
  func.func @_proj_res_ln_kernel(%arg0: i32, %arg1: i32, %arg2: memref<16x32xbf16, #tpu.memory_space<vmem>>, %arg3: memref<32x32xbf16, #tpu.memory_space<vmem>>, %arg4: memref<1x32xf32, #tpu.memory_space<vmem>>, %arg5: memref<16x32xbf16, #tpu.memory_space<vmem>>, %arg6: memref<1x32xf32, #tpu.memory_space<vmem>>, %arg7: memref<1x32xf32, #tpu.memory_space<vmem>>, %arg8: memref<16x32xbf16, #tpu.memory_space<vmem>>, %arg9: memref<16x32xf32, #tpu.memory_space<vmem>>) attributes {dimension_semantics = [#tpu.dimension_semantics<parallel>, #tpu.dimension_semantics<arbitrary>], iteration_bounds = array<i64: 1, 1>, scalar_prefetch = 0 : i64, scratch_operands = 1 : i64, tpu.core_type = #tpu.core_type<tc>, window_params = [{transform_indices = @transform_0, window_bounds = array<i64: 16, 32>}, {transform_indices = @transform_1, window_bounds = array<i64: 32, 32>}, {pipeline_mode = #tpu.pipeline_mode<synchronous>, transform_indices = @transform_2, window_bounds = array<i64: 1, 32>}, {transform_indices = @transform_3, window_bounds = array<i64: 16, 32>}, {pipeline_mode = #tpu.pipeline_mode<synchronous>, transform_indices = @transform_4, window_bounds = array<i64: 1, 32>}, {pipeline_mode = #tpu.pipeline_mode<synchronous>, transform_indices = @transform_5, window_bounds = array<i64: 1, 32>}, {transform_indices = @transform_6, window_bounds = array<i64: 16, 32>}]} {
    %c0_i32 = arith.constant 0 : i32
    %0 = arith.cmpi eq, %arg1, %c0_i32 : i32
    %1 = arith.extui %0 : i1 to i32
    %c0_i32_0 = arith.constant 0 : i32
    %2 = arith.cmpi ne, %1, %c0_i32_0 : i32
    scf.if %2 {
      %cst_10 = arith.constant 0.000000e+00 : f32
      %12 = vector.broadcast %cst_10 : f32 to vector<16x32xf32>
      %c0_11 = arith.constant 0 : index
      %c0_12 = arith.constant 0 : index
      %13 = vector.load %arg9[%c0_11, %c0_12] : memref<16x32xf32, #tpu.memory_space<vmem>>, vector<16x32xf32>
      tpu.vector_store %arg9[%c0_11, %c0_12], %12 {strides = array<i32>} : memref<16x32xf32, #tpu.memory_space<vmem>>, vector<16x32xf32>,
    } else {
    }
    %c0 = arith.constant 0 : index
    %c0_1 = arith.constant 0 : index
    %3 = vector.load %arg9[%c0, %c0_1] : memref<16x32xf32, #tpu.memory_space<vmem>>, vector<16x32xf32>
    %c0_2 = arith.constant 0 : index
    %c0_3 = arith.constant 0 : index
    %4 = vector.load %arg2[%c0_2, %c0_3] : memref<16x32xbf16, #tpu.memory_space<vmem>>, vector<16x32xbf16>
    %c0_4 = arith.constant 0 : index
    %c0_5 = arith.constant 0 : index
    %5 = vector.load %arg3[%c0_4, %c0_5] : memref<32x32xbf16, #tpu.memory_space<vmem>>, vector<32x32xbf16>
    %cst = arith.constant dense<0.000000e+00> : vector<16x32xf32>
    %6 = tpu.matmul %4, %5, %cst {dimension_numbers = #tpu.dot_dimension_numbers<[1], [0], [0], [1], [0, 0, 1, 1], [], []>} : vector<16x32xbf16>, vector<32x32xbf16>, vector<16x32xf32> -> vector<16x32xf32>
    %7 = arith.addf %3, %6 : vector<16x32xf32>
    %c0_6 = arith.constant 0 : index
    %c0_7 = arith.constant 0 : index
    %8 = vector.load %arg9[%c0_6, %c0_7] : memref<16x32xf32, #tpu.memory_space<vmem>>, vector<16x32xf32>
    tpu.vector_store %arg9[%c0_6, %c0_7], %7 {strides = array<i32>} : memref<16x32xf32, #tpu.memory_space<vmem>>, vector<16x32xf32>,
    %c0_i32_8 = arith.constant 0 : i32
    %9 = arith.cmpi eq, %arg1, %c0_i32_8 : i32
    %10 = arith.extui %9 : i1 to i32
    %c0_i32_9 = arith.constant 0 : i32
    %11 = arith.cmpi ne, %10, %c0_i32_9 : i32
    scf.if %11 {
      %c0_10 = arith.constant 0 : index
      %c0_11 = arith.constant 0 : index
      %12 = vector.load %arg9[%c0_10, %c0_11] : memref<16x32xf32, #tpu.memory_space<vmem>>, vector<16x32xf32>
      %c0_12 = arith.constant 0 : index
      %c0_13 = arith.constant 0 : index
      %13 = vector.load %arg4[%c0_12, %c0_13] : memref<1x32xf32, #tpu.memory_space<vmem>>, vector<1x32xf32>
      %14 = vector.broadcast %13 : vector<1x32xf32> to vector<16x32xf32>
      %15 = arith.addf %12, %14 : vector<16x32xf32>
      %c0_14 = arith.constant 0 : index
      %c0_15 = arith.constant 0 : index
      %16 = vector.load %arg5[%c0_14, %c0_15] : memref<16x32xbf16, #tpu.memory_space<vmem>>, vector<16x32xbf16>
      %17 = arith.extf %16 : vector<16x32xbf16> to vector<16x32xf32>
      %18 = arith.addf %15, %17 : vector<16x32xf32>
      %cst_16 = arith.constant dense<0.000000e+00> : vector<16xf32>
      %19 = vector.multi_reduction <add>, %18, %cst_16 [1] : vector<16x32xf32> to vector<16xf32>
      %20 = vector.shape_cast %19 : vector<16xf32> to vector<16x1xf32>
      %cst_17 = arith.constant 3.200000e+01 : f32
      %21 = vector.broadcast %cst_17 : f32 to vector<16x1xf32>
      %22 = arith.divf %20, %21 : vector<16x1xf32>
      %23 = vector.broadcast %22 : vector<16x1xf32> to vector<16x32xf32>
      %24 = arith.subf %18, %23 : vector<16x32xf32>
      %25 = vector.broadcast %22 : vector<16x1xf32> to vector<16x32xf32>
      %26 = arith.subf %18, %25 : vector<16x32xf32>
      %27 = arith.mulf %24, %26 : vector<16x32xf32>
      %cst_18 = arith.constant dense<0.000000e+00> : vector<16xf32>
      %28 = vector.multi_reduction <add>, %27, %cst_18 [1] : vector<16x32xf32> to vector<16xf32>
      %29 = vector.shape_cast %28 : vector<16xf32> to vector<16x1xf32>
      %cst_19 = arith.constant 3.200000e+01 : f32
      %30 = vector.broadcast %cst_19 : f32 to vector<16x1xf32>
      %31 = arith.divf %29, %30 : vector<16x1xf32>
      %32 = vector.broadcast %22 : vector<16x1xf32> to vector<16x32xf32>
      %33 = arith.subf %18, %32 : vector<16x32xf32>
      %cst_20 = arith.constant 9.99999974E-6 : f32
      %34 = vector.broadcast %cst_20 : f32 to vector<16x1xf32>
      %35 = arith.addf %31, %34 : vector<16x1xf32>
      %36 = math.rsqrt %35 : vector<16x1xf32>
      %37 = vector.broadcast %36 : vector<16x1xf32> to vector<16x32xf32>
      %38 = arith.mulf %33, %37 : vector<16x32xf32>
      %c0_21 = arith.constant 0 : index
      %c0_22 = arith.constant 0 : index
      %39 = vector.load %arg6[%c0_21, %c0_22] : memref<1x32xf32, #tpu.memory_space<vmem>>, vector<1x32xf32>
      %40 = vector.broadcast %39 : vector<1x32xf32> to vector<16x32xf32>
      %41 = arith.mulf %38, %40 : vector<16x32xf32>
      %c0_23 = arith.constant 0 : index
      %c0_24 = arith.constant 0 : index
      %42 = vector.load %arg7[%c0_23, %c0_24] : memref<1x32xf32, #tpu.memory_space<vmem>>, vector<1x32xf32>
      %43 = vector.broadcast %42 : vector<1x32xf32> to vector<16x32xf32>
      %44 = arith.addf %41, %43 : vector<16x32xf32>
      %45 = arith.truncf %44 : vector<16x32xf32> to vector<16x32xbf16>
      %c0_25 = arith.constant 0 : index
      %c0_26 = arith.constant 0 : index
      %46 = vector.load %arg8[%c0_25, %c0_26] : memref<16x32xbf16, #tpu.memory_space<vmem>>, vector<16x32xbf16>
      tpu.vector_store %arg8[%c0_25, %c0_26], %45 {strides = array<i32>} : memref<16x32xbf16, #tpu.memory_space<vmem>>, vector<16x32xbf16>,
    } else {
    }
    return
  }
  func.func @transform_0(%arg0: i32, %arg1: i32) -> (i32, i32) {
    %c0_i32 = arith.constant 0 : i32
    return %arg0, %arg1 : i32, i32
  }
  func.func @transform_1(%arg0: i32, %arg1: i32) -> (i32, i32) {
    %c0_i32 = arith.constant 0 : i32
    %c0_i32_0 = arith.constant 0 : i32
    return %arg1, %c0_i32 : i32, i32
  }
  func.func @transform_2(%arg0: i32, %arg1: i32) -> (i32, i32) {
    %c0_i32 = arith.constant 0 : i32
    %c0_i32_0 = arith.constant 0 : i32
    %c0_i32_1 = arith.constant 0 : i32
    return %c0_i32, %c0_i32_0 : i32, i32
  }
  func.func @transform_3(%arg0: i32, %arg1: i32) -> (i32, i32) {
    %c0_i32 = arith.constant 0 : i32
    %c0_i32_0 = arith.constant 0 : i32
    return %arg0, %c0_i32 : i32, i32
  }
  func.func @transform_4(%arg0: i32, %arg1: i32) -> (i32, i32) {
    %c0_i32 = arith.constant 0 : i32
    %c0_i32_0 = arith.constant 0 : i32
    %c0_i32_1 = arith.constant 0 : i32
    return %c0_i32, %c0_i32_0 : i32, i32
  }
  func.func @transform_5(%arg0: i32, %arg1: i32) -> (i32, i32) {
    %c0_i32 = arith.constant 0 : i32
    %c0_i32_0 = arith.constant 0 : i32
    %c0_i32_1 = arith.constant 0 : i32
    return %c0_i32, %c0_i32_0 : i32, i32
  }
  func.func @transform_6(%arg0: i32, %arg1: i32) -> (i32, i32) {
    %c0_i32 = arith.constant 0 : i32
    %c0_i32_0 = arith.constant 0 : i32
    return %arg0, %c0_i32 : i32, i32
  }
}

module attributes {stable_mosaic.version = 11 : i64} {
  func.func @_ffn_res_ln_kernel(%arg0: i32, %arg1: i32, %arg2: memref<16x32xbf16, #tpu.memory_space<vmem>>, %arg3: memref<32x64xbf16, #tpu.memory_space<vmem>>, %arg4: memref<1x64xf32, #tpu.memory_space<vmem>>, %arg5: memref<64x32xbf16, #tpu.memory_space<vmem>>, %arg6: memref<1x32xf32, #tpu.memory_space<vmem>>, %arg7: memref<1x32xf32, #tpu.memory_space<vmem>>, %arg8: memref<1x32xf32, #tpu.memory_space<vmem>>, %arg9: memref<16x32xbf16, #tpu.memory_space<vmem>>, %arg10: memref<16x32xf32, #tpu.memory_space<vmem>>) attributes {dimension_semantics = [#tpu.dimension_semantics<parallel>, #tpu.dimension_semantics<arbitrary>], iteration_bounds = array<i64: 1, 1>, scalar_prefetch = 0 : i64, scratch_operands = 1 : i64, tpu.core_type = #tpu.core_type<tc>, window_params = [{transform_indices = @transform_0, window_bounds = array<i64: 16, 32>}, {transform_indices = @transform_1, window_bounds = array<i64: 32, 64>}, {transform_indices = @transform_2, window_bounds = array<i64: 1, 64>}, {transform_indices = @transform_3, window_bounds = array<i64: 64, 32>}, {pipeline_mode = #tpu.pipeline_mode<synchronous>, transform_indices = @transform_4, window_bounds = array<i64: 1, 32>}, {pipeline_mode = #tpu.pipeline_mode<synchronous>, transform_indices = @transform_5, window_bounds = array<i64: 1, 32>}, {pipeline_mode = #tpu.pipeline_mode<synchronous>, transform_indices = @transform_6, window_bounds = array<i64: 1, 32>}, {transform_indices = @transform_7, window_bounds = array<i64: 16, 32>}]} {
    %c0_i32 = arith.constant 0 : i32
    %0 = arith.cmpi eq, %arg1, %c0_i32 : i32
    %1 = arith.extui %0 : i1 to i32
    %c0_i32_0 = arith.constant 0 : i32
    %2 = arith.cmpi ne, %1, %c0_i32_0 : i32
    scf.if %2 {
      %cst_16 = arith.constant 0.000000e+00 : f32
      %20 = vector.broadcast %cst_16 : f32 to vector<16x32xf32>
      %c0_17 = arith.constant 0 : index
      %c0_18 = arith.constant 0 : index
      %21 = vector.load %arg10[%c0_17, %c0_18] : memref<16x32xf32, #tpu.memory_space<vmem>>, vector<16x32xf32>
      tpu.vector_store %arg10[%c0_17, %c0_18], %20 {strides = array<i32>} : memref<16x32xf32, #tpu.memory_space<vmem>>, vector<16x32xf32>,
    } else {
    }
    %c0 = arith.constant 0 : index
    %c0_1 = arith.constant 0 : index
    %3 = vector.load %arg2[%c0, %c0_1] : memref<16x32xbf16, #tpu.memory_space<vmem>>, vector<16x32xbf16>
    %c0_2 = arith.constant 0 : index
    %c0_3 = arith.constant 0 : index
    %4 = vector.load %arg3[%c0_2, %c0_3] : memref<32x64xbf16, #tpu.memory_space<vmem>>, vector<32x64xbf16>
    %cst = arith.constant dense<0.000000e+00> : vector<16x64xf32>
    %5 = tpu.matmul %3, %4, %cst {dimension_numbers = #tpu.dot_dimension_numbers<[1], [0], [0], [1], [0, 0, 1, 1], [], []>} : vector<16x32xbf16>, vector<32x64xbf16>, vector<16x64xf32> -> vector<16x64xf32>
    %c0_4 = arith.constant 0 : index
    %c0_5 = arith.constant 0 : index
    %6 = vector.load %arg4[%c0_4, %c0_5] : memref<1x64xf32, #tpu.memory_space<vmem>>, vector<1x64xf32>
    %7 = vector.broadcast %6 : vector<1x64xf32> to vector<16x64xf32>
    %8 = arith.addf %5, %7 : vector<16x64xf32>
    %cst_6 = arith.constant 0.000000e+00 : f32
    %9 = vector.broadcast %cst_6 : f32 to vector<16x64xf32>
    %10 = arith.maximumf %8, %9 : vector<16x64xf32>
    %c0_7 = arith.constant 0 : index
    %c0_8 = arith.constant 0 : index
    %11 = vector.load %arg10[%c0_7, %c0_8] : memref<16x32xf32, #tpu.memory_space<vmem>>, vector<16x32xf32>
    %12 = arith.truncf %10 : vector<16x64xf32> to vector<16x64xbf16>
    %c0_9 = arith.constant 0 : index
    %c0_10 = arith.constant 0 : index
    %13 = vector.load %arg5[%c0_9, %c0_10] : memref<64x32xbf16, #tpu.memory_space<vmem>>, vector<64x32xbf16>
    %cst_11 = arith.constant dense<0.000000e+00> : vector<16x32xf32>
    %14 = tpu.matmul %12, %13, %cst_11 {dimension_numbers = #tpu.dot_dimension_numbers<[1], [0], [0], [1], [0, 0, 1, 1], [], []>} : vector<16x64xbf16>, vector<64x32xbf16>, vector<16x32xf32> -> vector<16x32xf32>
    %15 = arith.addf %11, %14 : vector<16x32xf32>
    %c0_12 = arith.constant 0 : index
    %c0_13 = arith.constant 0 : index
    %16 = vector.load %arg10[%c0_12, %c0_13] : memref<16x32xf32, #tpu.memory_space<vmem>>, vector<16x32xf32>
    tpu.vector_store %arg10[%c0_12, %c0_13], %15 {strides = array<i32>} : memref<16x32xf32, #tpu.memory_space<vmem>>, vector<16x32xf32>,
    %c0_i32_14 = arith.constant 0 : i32
    %17 = arith.cmpi eq, %arg1, %c0_i32_14 : i32
    %18 = arith.extui %17 : i1 to i32
    %c0_i32_15 = arith.constant 0 : i32
    %19 = arith.cmpi ne, %18, %c0_i32_15 : i32
    scf.if %19 {
      %c0_16 = arith.constant 0 : index
      %c0_17 = arith.constant 0 : index
      %20 = vector.load %arg10[%c0_16, %c0_17] : memref<16x32xf32, #tpu.memory_space<vmem>>, vector<16x32xf32>
      %c0_18 = arith.constant 0 : index
      %c0_19 = arith.constant 0 : index
      %21 = vector.load %arg6[%c0_18, %c0_19] : memref<1x32xf32, #tpu.memory_space<vmem>>, vector<1x32xf32>
      %22 = vector.broadcast %21 : vector<1x32xf32> to vector<16x32xf32>
      %23 = arith.addf %20, %22 : vector<16x32xf32>
      %c0_20 = arith.constant 0 : index
      %c0_21 = arith.constant 0 : index
      %24 = vector.load %arg2[%c0_20, %c0_21] : memref<16x32xbf16, #tpu.memory_space<vmem>>, vector<16x32xbf16>
      %25 = arith.extf %24 : vector<16x32xbf16> to vector<16x32xf32>
      %26 = arith.addf %23, %25 : vector<16x32xf32>
      %cst_22 = arith.constant dense<0.000000e+00> : vector<16xf32>
      %27 = vector.multi_reduction <add>, %26, %cst_22 [1] : vector<16x32xf32> to vector<16xf32>
      %28 = vector.shape_cast %27 : vector<16xf32> to vector<16x1xf32>
      %cst_23 = arith.constant 3.200000e+01 : f32
      %29 = vector.broadcast %cst_23 : f32 to vector<16x1xf32>
      %30 = arith.divf %28, %29 : vector<16x1xf32>
      %31 = vector.broadcast %30 : vector<16x1xf32> to vector<16x32xf32>
      %32 = arith.subf %26, %31 : vector<16x32xf32>
      %33 = vector.broadcast %30 : vector<16x1xf32> to vector<16x32xf32>
      %34 = arith.subf %26, %33 : vector<16x32xf32>
      %35 = arith.mulf %32, %34 : vector<16x32xf32>
      %cst_24 = arith.constant dense<0.000000e+00> : vector<16xf32>
      %36 = vector.multi_reduction <add>, %35, %cst_24 [1] : vector<16x32xf32> to vector<16xf32>
      %37 = vector.shape_cast %36 : vector<16xf32> to vector<16x1xf32>
      %cst_25 = arith.constant 3.200000e+01 : f32
      %38 = vector.broadcast %cst_25 : f32 to vector<16x1xf32>
      %39 = arith.divf %37, %38 : vector<16x1xf32>
      %40 = vector.broadcast %30 : vector<16x1xf32> to vector<16x32xf32>
      %41 = arith.subf %26, %40 : vector<16x32xf32>
      %cst_26 = arith.constant 9.99999974E-6 : f32
      %42 = vector.broadcast %cst_26 : f32 to vector<16x1xf32>
      %43 = arith.addf %39, %42 : vector<16x1xf32>
      %44 = math.rsqrt %43 : vector<16x1xf32>
      %45 = vector.broadcast %44 : vector<16x1xf32> to vector<16x32xf32>
      %46 = arith.mulf %41, %45 : vector<16x32xf32>
      %c0_27 = arith.constant 0 : index
      %c0_28 = arith.constant 0 : index
      %47 = vector.load %arg7[%c0_27, %c0_28] : memref<1x32xf32, #tpu.memory_space<vmem>>, vector<1x32xf32>
      %48 = vector.broadcast %47 : vector<1x32xf32> to vector<16x32xf32>
      %49 = arith.mulf %46, %48 : vector<16x32xf32>
      %c0_29 = arith.constant 0 : index
      %c0_30 = arith.constant 0 : index
      %50 = vector.load %arg8[%c0_29, %c0_30] : memref<1x32xf32, #tpu.memory_space<vmem>>, vector<1x32xf32>
      %51 = vector.broadcast %50 : vector<1x32xf32> to vector<16x32xf32>
      %52 = arith.addf %49, %51 : vector<16x32xf32>
      %53 = arith.truncf %52 : vector<16x32xf32> to vector<16x32xbf16>
      %c0_31 = arith.constant 0 : index
      %c0_32 = arith.constant 0 : index
      %54 = vector.load %arg9[%c0_31, %c0_32] : memref<16x32xbf16, #tpu.memory_space<vmem>>, vector<16x32xbf16>
      tpu.vector_store %arg9[%c0_31, %c0_32], %53 {strides = array<i32>} : memref<16x32xbf16, #tpu.memory_space<vmem>>, vector<16x32xbf16>,
    } else {
    }
    return
  }
  func.func @transform_0(%arg0: i32, %arg1: i32) -> (i32, i32) {
    %c0_i32 = arith.constant 0 : i32
    %c0_i32_0 = arith.constant 0 : i32
    return %arg0, %c0_i32 : i32, i32
  }
  func.func @transform_1(%arg0: i32, %arg1: i32) -> (i32, i32) {
    %c0_i32 = arith.constant 0 : i32
    %c0_i32_0 = arith.constant 0 : i32
    return %c0_i32, %arg1 : i32, i32
  }
  func.func @transform_2(%arg0: i32, %arg1: i32) -> (i32, i32) {
    %c0_i32 = arith.constant 0 : i32
    %c0_i32_0 = arith.constant 0 : i32
    return %c0_i32, %arg1 : i32, i32
  }
  func.func @transform_3(%arg0: i32, %arg1: i32) -> (i32, i32) {
    %c0_i32 = arith.constant 0 : i32
    %c0_i32_0 = arith.constant 0 : i32
    return %arg1, %c0_i32 : i32, i32
  }
  func.func @transform_4(%arg0: i32, %arg1: i32) -> (i32, i32) {
    %c0_i32 = arith.constant 0 : i32
    %c0_i32_0 = arith.constant 0 : i32
    %c0_i32_1 = arith.constant 0 : i32
    return %c0_i32, %c0_i32_0 : i32, i32
  }
  func.func @transform_5(%arg0: i32, %arg1: i32) -> (i32, i32) {
    %c0_i32 = arith.constant 0 : i32
    %c0_i32_0 = arith.constant 0 : i32
    %c0_i32_1 = arith.constant 0 : i32
    return %c0_i32, %c0_i32_0 : i32, i32
  }
  func.func @transform_6(%arg0: i32, %arg1: i32) -> (i32, i32) {
    %c0_i32 = arith.constant 0 : i32
    %c0_i32_0 = arith.constant 0 : i32
    %c0_i32_1 = arith.constant 0 : i32
    return %c0_i32, %c0_i32_0 : i32, i32
  }
  func.func @transform_7(%arg0: i32, %arg1: i32) -> (i32, i32) {
    %c0_i32 = arith.constant 0 : i32
    %c0_i32_0 = arith.constant 0 : i32
    return %arg0, %c0_i32 : i32, i32
  }
}

module attributes {stable_mosaic.version = 11 : i64} {
  func.func @_matmul_bias_kernel(%arg0: i32, %arg1: i32, %arg2: i32, %arg3: memref<16x32xbf16, #tpu.memory_space<vmem>>, %arg4: memref<32x96xbf16, #tpu.memory_space<vmem>>, %arg5: memref<1x96xf32, #tpu.memory_space<vmem>>, %arg6: memref<16x96xbf16, #tpu.memory_space<vmem>>, %arg7: memref<16x96xf32, #tpu.memory_space<vmem>>) attributes {dimension_semantics = [#tpu.dimension_semantics<parallel>, #tpu.dimension_semantics<parallel>, #tpu.dimension_semantics<arbitrary>], iteration_bounds = array<i64: 1, 1, 1>, scalar_prefetch = 0 : i64, scratch_operands = 1 : i64, tpu.core_type = #tpu.core_type<tc>, window_params = [{transform_indices = @transform_0, window_bounds = array<i64: 16, 32>}, {transform_indices = @transform_1, window_bounds = array<i64: 32, 96>}, {transform_indices = @transform_2, window_bounds = array<i64: 1, 96>}, {transform_indices = @transform_3, window_bounds = array<i64: 16, 96>}]} {
    %c0_i32 = arith.constant 0 : i32
    %0 = arith.cmpi eq, %arg2, %c0_i32 : i32
    %1 = arith.extui %0 : i1 to i32
    %c0_i32_0 = arith.constant 0 : i32
    %2 = arith.cmpi ne, %1, %c0_i32_0 : i32
    scf.if %2 {
      %cst_10 = arith.constant 0.000000e+00 : f32
      %12 = vector.broadcast %cst_10 : f32 to vector<16x96xf32>
      %c0_11 = arith.constant 0 : index
      %c0_12 = arith.constant 0 : index
      %13 = vector.load %arg7[%c0_11, %c0_12] : memref<16x96xf32, #tpu.memory_space<vmem>>, vector<16x96xf32>
      tpu.vector_store %arg7[%c0_11, %c0_12], %12 {strides = array<i32>} : memref<16x96xf32, #tpu.memory_space<vmem>>, vector<16x96xf32>,
    } else {
    }
    %c0 = arith.constant 0 : index
    %c0_1 = arith.constant 0 : index
    %3 = vector.load %arg7[%c0, %c0_1] : memref<16x96xf32, #tpu.memory_space<vmem>>, vector<16x96xf32>
    %c0_2 = arith.constant 0 : index
    %c0_3 = arith.constant 0 : index
    %4 = vector.load %arg3[%c0_2, %c0_3] : memref<16x32xbf16, #tpu.memory_space<vmem>>, vector<16x32xbf16>
    %c0_4 = arith.constant 0 : index
    %c0_5 = arith.constant 0 : index
    %5 = vector.load %arg4[%c0_4, %c0_5] : memref<32x96xbf16, #tpu.memory_space<vmem>>, vector<32x96xbf16>
    %cst = arith.constant dense<0.000000e+00> : vector<16x96xf32>
    %6 = tpu.matmul %4, %5, %cst {dimension_numbers = #tpu.dot_dimension_numbers<[1], [0], [0], [1], [0, 0, 1, 1], [], []>} : vector<16x32xbf16>, vector<32x96xbf16>, vector<16x96xf32> -> vector<16x96xf32>
    %7 = arith.addf %3, %6 : vector<16x96xf32>
    %c0_6 = arith.constant 0 : index
    %c0_7 = arith.constant 0 : index
    %8 = vector.load %arg7[%c0_6, %c0_7] : memref<16x96xf32, #tpu.memory_space<vmem>>, vector<16x96xf32>
    tpu.vector_store %arg7[%c0_6, %c0_7], %7 {strides = array<i32>} : memref<16x96xf32, #tpu.memory_space<vmem>>, vector<16x96xf32>,
    %c0_i32_8 = arith.constant 0 : i32
    %9 = arith.cmpi eq, %arg2, %c0_i32_8 : i32
    %10 = arith.extui %9 : i1 to i32
    %c0_i32_9 = arith.constant 0 : i32
    %11 = arith.cmpi ne, %10, %c0_i32_9 : i32
    scf.if %11 {
      %c0_10 = arith.constant 0 : index
      %c0_11 = arith.constant 0 : index
      %12 = vector.load %arg7[%c0_10, %c0_11] : memref<16x96xf32, #tpu.memory_space<vmem>>, vector<16x96xf32>
      %c0_12 = arith.constant 0 : index
      %c0_13 = arith.constant 0 : index
      %13 = vector.load %arg5[%c0_12, %c0_13] : memref<1x96xf32, #tpu.memory_space<vmem>>, vector<1x96xf32>
      %14 = vector.broadcast %13 : vector<1x96xf32> to vector<16x96xf32>
      %15 = arith.addf %12, %14 : vector<16x96xf32>
      %16 = arith.truncf %15 : vector<16x96xf32> to vector<16x96xbf16>
      %c0_14 = arith.constant 0 : index
      %c0_15 = arith.constant 0 : index
      %17 = vector.load %arg6[%c0_14, %c0_15] : memref<16x96xbf16, #tpu.memory_space<vmem>>, vector<16x96xbf16>
      tpu.vector_store %arg6[%c0_14, %c0_15], %16 {strides = array<i32>} : memref<16x96xbf16, #tpu.memory_space<vmem>>, vector<16x96xbf16>,
    } else {
    }
    return
  }
  func.func @transform_0(%arg0: i32, %arg1: i32, %arg2: i32) -> (i32, i32) {
    %c0_i32 = arith.constant 0 : i32
    return %arg0, %arg2 : i32, i32
  }
  func.func @transform_1(%arg0: i32, %arg1: i32, %arg2: i32) -> (i32, i32) {
    %c0_i32 = arith.constant 0 : i32
    return %arg2, %arg1 : i32, i32
  }
  func.func @transform_2(%arg0: i32, %arg1: i32, %arg2: i32) -> (i32, i32) {
    %c0_i32 = arith.constant 0 : i32
    %c0_i32_0 = arith.constant 0 : i32
    return %c0_i32, %arg1 : i32, i32
  }
  func.func @transform_3(%arg0: i32, %arg1: i32, %arg2: i32) -> (i32, i32) {
    %c0_i32 = arith.constant 0 : i32
    return %arg0, %arg1 : i32, i32
  }
}

module attributes {stable_mosaic.version = 11 : i64} {
  func.func @_ffn_res_ln_kernel(%arg0: i32, %arg1: i32, %arg2: memref<16x32xbf16, #tpu.memory_space<vmem>>, %arg3: memref<32x64xbf16, #tpu.memory_space<vmem>>, %arg4: memref<1x64xf32, #tpu.memory_space<vmem>>, %arg5: memref<64x32xbf16, #tpu.memory_space<vmem>>, %arg6: memref<1x32xf32, #tpu.memory_space<vmem>>, %arg7: memref<1x32xf32, #tpu.memory_space<vmem>>, %arg8: memref<1x32xf32, #tpu.memory_space<vmem>>, %arg9: memref<16x32xbf16, #tpu.memory_space<vmem>>, %arg10: memref<16x32xf32, #tpu.memory_space<vmem>>) attributes {dimension_semantics = [#tpu.dimension_semantics<parallel>, #tpu.dimension_semantics<arbitrary>], iteration_bounds = array<i64: 1, 1>, scalar_prefetch = 0 : i64, scratch_operands = 1 : i64, tpu.core_type = #tpu.core_type<tc>, window_params = [{transform_indices = @transform_0, window_bounds = array<i64: 16, 32>}, {transform_indices = @transform_1, window_bounds = array<i64: 32, 64>}, {transform_indices = @transform_2, window_bounds = array<i64: 1, 64>}, {transform_indices = @transform_3, window_bounds = array<i64: 64, 32>}, {pipeline_mode = #tpu.pipeline_mode<synchronous>, transform_indices = @transform_4, window_bounds = array<i64: 1, 32>}, {pipeline_mode = #tpu.pipeline_mode<synchronous>, transform_indices = @transform_5, window_bounds = array<i64: 1, 32>}, {pipeline_mode = #tpu.pipeline_mode<synchronous>, transform_indices = @transform_6, window_bounds = array<i64: 1, 32>}, {transform_indices = @transform_7, window_bounds = array<i64: 16, 32>}]} {
    %c0_i32 = arith.constant 0 : i32
    %0 = arith.cmpi eq, %arg1, %c0_i32 : i32
    %1 = arith.extui %0 : i1 to i32
    %c0_i32_0 = arith.constant 0 : i32
    %2 = arith.cmpi ne, %1, %c0_i32_0 : i32
    scf.if %2 {
      %cst_16 = arith.constant 0.000000e+00 : f32
      %20 = vector.broadcast %cst_16 : f32 to vector<16x32xf32>
      %c0_17 = arith.constant 0 : index
      %c0_18 = arith.constant 0 : index
      %21 = vector.load %arg10[%c0_17, %c0_18] : memref<16x32xf32, #tpu.memory_space<vmem>>, vector<16x32xf32>
      tpu.vector_store %arg10[%c0_17, %c0_18], %20 {strides = array<i32>} : memref<16x32xf32, #tpu.memory_space<vmem>>, vector<16x32xf32>,
    } else {
    }
    %c0 = arith.constant 0 : index
    %c0_1 = arith.constant 0 : index
    %3 = vector.load %arg2[%c0, %c0_1] : memref<16x32xbf16, #tpu.memory_space<vmem>>, vector<16x32xbf16>
    %c0_2 = arith.constant 0 : index
    %c0_3 = arith.constant 0 : index
    %4 = vector.load %arg3[%c0_2, %c0_3] : memref<32x64xbf16, #tpu.memory_space<vmem>>, vector<32x64xbf16>
    %cst = arith.constant dense<0.000000e+00> : vector<16x64xf32>
    %5 = tpu.matmul %3, %4, %cst {dimension_numbers = #tpu.dot_dimension_numbers<[1], [0], [0], [1], [0, 0, 1, 1], [], []>} : vector<16x32xbf16>, vector<32x64xbf16>, vector<16x64xf32> -> vector<16x64xf32>
    %c0_4 = arith.constant 0 : index
    %c0_5 = arith.constant 0 : index
    %6 = vector.load %arg4[%c0_4, %c0_5] : memref<1x64xf32, #tpu.memory_space<vmem>>, vector<1x64xf32>
    %7 = vector.broadcast %6 : vector<1x64xf32> to vector<16x64xf32>
    %8 = arith.addf %5, %7 : vector<16x64xf32>
    %cst_6 = arith.constant 0.000000e+00 : f32
    %9 = vector.broadcast %cst_6 : f32 to vector<16x64xf32>
    %10 = arith.maximumf %8, %9 : vector<16x64xf32>
    %c0_7 = arith.constant 0 : index
    %c0_8 = arith.constant 0 : index
    %11 = vector.load %arg10[%c0_7, %c0_8] : memref<16x32xf32, #tpu.memory_space<vmem>>, vector<16x32xf32>
    %12 = arith.truncf %10 : vector<16x64xf32> to vector<16x64xbf16>
    %c0_9 = arith.constant 0 : index
    %c0_10 = arith.constant 0 : index
    %13 = vector.load %arg5[%c0_9, %c0_10] : memref<64x32xbf16, #tpu.memory_space<vmem>>, vector<64x32xbf16>
    %cst_11 = arith.constant dense<0.000000e+00> : vector<16x32xf32>
    %14 = tpu.matmul %12, %13, %cst_11 {dimension_numbers = #tpu.dot_dimension_numbers<[1], [0], [0], [1], [0, 0, 1, 1], [], []>} : vector<16x64xbf16>, vector<64x32xbf16>, vector<16x32xf32> -> vector<16x32xf32>
    %15 = arith.addf %11, %14 : vector<16x32xf32>
    %c0_12 = arith.constant 0 : index
    %c0_13 = arith.constant 0 : index
    %16 = vector.load %arg10[%c0_12, %c0_13] : memref<16x32xf32, #tpu.memory_space<vmem>>, vector<16x32xf32>
    tpu.vector_store %arg10[%c0_12, %c0_13], %15 {strides = array<i32>} : memref<16x32xf32, #tpu.memory_space<vmem>>, vector<16x32xf32>,
    %c0_i32_14 = arith.constant 0 : i32
    %17 = arith.cmpi eq, %arg1, %c0_i32_14 : i32
    %18 = arith.extui %17 : i1 to i32
    %c0_i32_15 = arith.constant 0 : i32
    %19 = arith.cmpi ne, %18, %c0_i32_15 : i32
    scf.if %19 {
      %c0_16 = arith.constant 0 : index
      %c0_17 = arith.constant 0 : index
      %20 = vector.load %arg10[%c0_16, %c0_17] : memref<16x32xf32, #tpu.memory_space<vmem>>, vector<16x32xf32>
      %c0_18 = arith.constant 0 : index
      %c0_19 = arith.constant 0 : index
      %21 = vector.load %arg6[%c0_18, %c0_19] : memref<1x32xf32, #tpu.memory_space<vmem>>, vector<1x32xf32>
      %22 = vector.broadcast %21 : vector<1x32xf32> to vector<16x32xf32>
      %23 = arith.addf %20, %22 : vector<16x32xf32>
      %c0_20 = arith.constant 0 : index
      %c0_21 = arith.constant 0 : index
      %24 = vector.load %arg2[%c0_20, %c0_21] : memref<16x32xbf16, #tpu.memory_space<vmem>>, vector<16x32xbf16>
      %25 = arith.extf %24 : vector<16x32xbf16> to vector<16x32xf32>
      %26 = arith.addf %23, %25 : vector<16x32xf32>
      %cst_22 = arith.constant dense<0.000000e+00> : vector<16xf32>
      %27 = vector.multi_reduction <add>, %26, %cst_22 [1] : vector<16x32xf32> to vector<16xf32>
      %28 = vector.shape_cast %27 : vector<16xf32> to vector<16x1xf32>
      %cst_23 = arith.constant 3.200000e+01 : f32
      %29 = vector.broadcast %cst_23 : f32 to vector<16x1xf32>
      %30 = arith.divf %28, %29 : vector<16x1xf32>
      %31 = vector.broadcast %30 : vector<16x1xf32> to vector<16x32xf32>
      %32 = arith.subf %26, %31 : vector<16x32xf32>
      %33 = vector.broadcast %30 : vector<16x1xf32> to vector<16x32xf32>
      %34 = arith.subf %26, %33 : vector<16x32xf32>
      %35 = arith.mulf %32, %34 : vector<16x32xf32>
      %cst_24 = arith.constant dense<0.000000e+00> : vector<16xf32>
      %36 = vector.multi_reduction <add>, %35, %cst_24 [1] : vector<16x32xf32> to vector<16xf32>
      %37 = vector.shape_cast %36 : vector<16xf32> to vector<16x1xf32>
      %cst_25 = arith.constant 3.200000e+01 : f32
      %38 = vector.broadcast %cst_25 : f32 to vector<16x1xf32>
      %39 = arith.divf %37, %38 : vector<16x1xf32>
      %40 = vector.broadcast %30 : vector<16x1xf32> to vector<16x32xf32>
      %41 = arith.subf %26, %40 : vector<16x32xf32>
      %cst_26 = arith.constant 9.99999974E-6 : f32
      %42 = vector.broadcast %cst_26 : f32 to vector<16x1xf32>
      %43 = arith.addf %39, %42 : vector<16x1xf32>
      %44 = math.rsqrt %43 : vector<16x1xf32>
      %45 = vector.broadcast %44 : vector<16x1xf32> to vector<16x32xf32>
      %46 = arith.mulf %41, %45 : vector<16x32xf32>
      %c0_27 = arith.constant 0 : index
      %c0_28 = arith.constant 0 : index
      %47 = vector.load %arg7[%c0_27, %c0_28] : memref<1x32xf32, #tpu.memory_space<vmem>>, vector<1x32xf32>
      %48 = vector.broadcast %47 : vector<1x32xf32> to vector<16x32xf32>
      %49 = arith.mulf %46, %48 : vector<16x32xf32>
      %c0_29 = arith.constant 0 : index
      %c0_30 = arith.constant 0 : index
      %50 = vector.load %arg8[%c0_29, %c0_30] : memref<1x32xf32, #tpu.memory_space<vmem>>, vector<1x32xf32>
      %51 = vector.broadcast %50 : vector<1x32xf32> to vector<16x32xf32>
      %52 = arith.addf %49, %51 : vector<16x32xf32>
      %53 = arith.truncf %52 : vector<16x32xf32> to vector<16x32xbf16>
      %c0_31 = arith.constant 0 : index
      %c0_32 = arith.constant 0 : index
      %54 = vector.load %arg9[%c0_31, %c0_32] : memref<16x32xbf16, #tpu.memory_space<vmem>>, vector<16x32xbf16>
      tpu.vector_store %arg9[%c0_31, %c0_32], %53 {strides = array<i32>} : memref<16x32xbf16, #tpu.memory_space<vmem>>, vector<16x32xbf16>,
    } else {
    }
    return
  }
  func.func @transform_0(%arg0: i32, %arg1: i32) -> (i32, i32) {
    %c0_i32 = arith.constant 0 : i32
    %c0_i32_0 = arith.constant 0 : i32
    return %arg0, %c0_i32 : i32, i32
  }
  func.func @transform_1(%arg0: i32, %arg1: i32) -> (i32, i32) {
    %c0_i32 = arith.constant 0 : i32
    %c0_i32_0 = arith.constant 0 : i32
    return %c0_i32, %arg1 : i32, i32
  }
  func.func @transform_2(%arg0: i32, %arg1: i32) -> (i32, i32) {
    %c0_i32 = arith.constant 0 : i32
    %c0_i32_0 = arith.constant 0 : i32
    return %c0_i32, %arg1 : i32, i32
  }
  func.func @transform_3(%arg0: i32, %arg1: i32) -> (i32, i32) {
    %c0_i32 = arith.constant 0 : i32
    %c0_i32_0 = arith.constant 0 : i32
    return %arg1, %c0_i32 : i32, i32
  }
  func.func @transform_4(%arg0: i32, %arg1: i32) -> (i32, i32) {
    %c0_i32 = arith.constant 0 : i32
    %c0_i32_0 = arith.constant 0 : i32
    %c0_i32_1 = arith.constant 0 : i32
    return %c0_i32, %c0_i32_0 : i32, i32
  }
  func.func @transform_5(%arg0: i32, %arg1: i32) -> (i32, i32) {
    %c0_i32 = arith.constant 0 : i32
    %c0_i32_0 = arith.constant 0 : i32
    %c0_i32_1 = arith.constant 0 : i32
    return %c0_i32, %c0_i32_0 : i32, i32
  }
  func.func @transform_6(%arg0: i32, %arg1: i32) -> (i32, i32) {
    %c0_i32 = arith.constant 0 : i32
    %c0_i32_0 = arith.constant 0 : i32
    %c0_i32_1 = arith.constant 0 : i32
    return %c0_i32, %c0_i32_0 : i32, i32
  }
  func.func @transform_7(%arg0: i32, %arg1: i32) -> (i32, i32) {
    %c0_i32 = arith.constant 0 : i32
    %c0_i32_0 = arith.constant 0 : i32
    return %arg0, %c0_i32 : i32, i32
  }
}

</mosaic_0001>

<bundles_post_ra>
// kernel: ts_encoder.8
= control target key start
LH: loop header
LB: loop body
LE: loop exit
PB: predicated region body
PF: predicated region fallthrough
CT: control target
= control target key end

     0   :  { %8 = vsyncpa [#allocation4], 0  ;;  %s150_s15 = smov [#allocation3]   ;;  %s194_s0 = inlined_call_operand.vmem [shape: bf16[16,32], index: 0, kind: input, shape index: {}]   ;;  %s195_s1 = inlined_call_operand.vmem [shape: bf16[32,96], index: 1, kind: input, shape index: {}]   ;;  %s196_s2 = inlined_call_operand.hbm [shape: f32[1,96], index: 2, kind: input, shape index: {}]   ;;  %s197_s3 = inlined_call_operand.vmem [shape: bf16[16,96], index: 3, kind: output, shape index: {}]  }
   0x1   :  { %s18_s14 = sshll.u32 %s196_s2, 4  ;;  %s20_s16 = sshll.u32 %s150_s15, 4  ;;  %s19_s14 = int_to_ptr.hbm [resolvable:$true] %s18_s14  ;;  %s21_s16 = int_to_ptr.vmem [resolvable:$true] %s20_s16 }
   0x2   :  { %23 = dma.hbm_to_vmem [thread:$0]  %s19_s14, 16, %s21_s16, [#allocation4]  }
   0x3   :  { %148 = dma.done.wait [#allocation4], 16  }
   0x4   :  { %149 = vsyncadd [#allocation4], 4294967280  ;;  %vm33_vm0 = vcmask 785408   ;;  %v151_v0 = vmov 0.0   ;;  %v120_v1 = vld [vmem:[%s195_s1 + $0x8] sm:$0xff]  ;;  %v119_v2 = vld [vmem:[%s195_s1] sm:$0xff] }
   0x5   :  { %34 = vst.msk [vmem:[#allocation2] sm:$0xff] %vm33_vm0, %v151_v0  ;;  %71 = vmatpush.bf16.msra.mxu0 %v120_v1  ;;  %v118_v3 = vld [vmem:[%s194_s0] sm:$0xff]  ;;  %vm61_vm1 = vcmask 261120   ;;  %v123_v8 = vld [vmem:[#allocation3] ss:$0 sm:$0xff]  ;;  %vm97_vm2 = vcmask 781312  }
   0x6   :  { %35 = vst.msk [vmem:[#allocation2 + $0x8] sm:$0xff] %vm33_vm0, %v151_v0 }
   0x9   :  { %72 = vmatpush.bf16.msra.mxu0 %v119_v2 }
   0xc   :  { %117 = vmatmul.msk.bf16.vlgmr.msra.gmra.mxu0 %vm61_vm1, %v118_v3  ;;  %v36_v4 = vld [vmem:[#allocation2] sm:$0xff] }
   0xd   :  { %v37_v7 = vld [vmem:[#allocation2 + $0x8] sm:$0xff] }
  0x89   :  { %v74_v5 = vpop.f32.mrf.mxu0 }
  0x8a   :  { %v79_v6 = vadd.f32 %v74_v5, %v36_v4 }
  0x8c   :  { %82 = vst.msk [vmem:[#allocation2] sm:$0xff] %vm33_vm0, %v79_v6 }
  0x91   :  { %v76_v9 = vpop.f32.mrf.mxu0 }
  0x92   :  { %v80_v10 = vadd.f32 %v76_v9, %v37_v7 }
  0x93   :  { %v87_v11 = vld [vmem:[#allocation2] sm:$0xff] }
  0x94   :  { %v93_v12 = vadd.f32 %v123_v8, %v87_v11  ;;  %83 = vst.msk [vmem:[#allocation2 + $0x8] sm:$0xff] %vm33_vm0, %v80_v10 }
  0x96   :  { %v95_v13 = vpack.c.bf16 %v93_v12, %v93_v12 }
  0x98   :  { %98 = vst.msk [vmem:[%s197_s3] sm:$0xf] %vm97_vm2, %v95_v13 }
  0x9b   :  { %v88_v14 = vld [vmem:[#allocation2 + $0x8] sm:$0xff] }
  0x9c   :  { %v94_v15 = vadd.f32 %v123_v8, %v88_v14 }
  0x9e   :  { %v96_v16 = vpack.c.bf16 %v94_v15, %v94_v15 }
  0xa0   :  { %99 = vst.msk [vmem:[%s197_s3 + $0x4] sm:$0xf] %vm97_vm2, %v96_v16 }
  0xa1   :  { %104 = vsyncpa [#allocation4], 1 }

// kernel: ts_encoder.9
= control target key start
LH: loop header
LB: loop body
LE: loop exit
PB: predicated region body
PF: predicated region fallthrough
CT: control target
= control target key end

     0   :  { %s965_s0 = inlined_call_operand.vmem [shape: bf16[2,4,8,8], index: 0, kind: input, shape index: {}]   ;;  %s966_s1 = inlined_call_operand.vmem [shape: bf16[2,4,8,8], index: 1, kind: input, shape index: {}]   ;;  %s967_s2 = inlined_call_operand.vmem [shape: bf16[2,4,8,8], index: 2, kind: input, shape index: {}]   ;;  %s968_s3 = inlined_call_operand.vmem [shape: bf16[2,4,8,8], index: 3, kind: output, shape index: {0}]   ;;  %s969_s4 = inlined_call_operand.hbm [shape: f32[2,4,8,8], index: 4, kind: output, shape index: {1}]  }
   0x1   :  { %970 = sst [smem:[#allocation5_spill]] %s965_s0 }
   0x2   :  { %971 = sst [smem:[#allocation6_spill]] %s966_s1 }
   0x3   :  { %10 = vsyncpa [#allocation3], 0 }
   0x4   :  { %12 = vsyncpa [#allocation3 + $0x1], 0  ;;  %s822_s15 = smov 0   ;;  %s824_s16 = smov 0  }
   0x5   :  { %s826_s17 = smov 0   ;;  %s828_s18 = smov 0  }
   0x6   :  { %s830_s19 = smov 0   ;;  %s832_s20 = smov 0  }
   0x7   :  { %s834_s21 = smov 0   ;;  %s836_s22 = smov 0  }
   0x8 LB: > { %s605_s23 = sadd.s32 4294967295, %s795_s22   ;;  %s606_s24 = sadd.s32 4294967294, %s795_s22   ;;  %s795_s22 = sphi %s836_s22, %s18_s22   ;;  %s791_s21 = sphi %s834_s21, %s982_s21   ;;  %s787_s20 = sphi %s832_s20, %s981_s20   ;;  %s783_s19 = sphi %s830_s19, %s980_s19   ;;  %s779_s18 = sphi %s828_s18, %s979_s18   ;;  %s775_s17 = sphi %s826_s17, %s978_s17   ;;  %s771_s16 = sphi %s824_s16, %s977_s16   ;;  %s767_s15 = sphi %s822_s15, %s976_s15  }
   0x9   : > { %s33_s25 = sadd.s32 1, %s787_s20  ;;  %s37_s26 = sadd.s32 1, %s791_s21 }
   0xa   : > { %p35_p0 = scmp.ge.s32.totalorder %s33_s25, 4  ;;  %p174_p1 = scmp.ne.s32.totalorder %s775_s17, %s771_s16 }
   0xb   : > { %p175_p2 = scmp.eq.s32.totalorder %s605_s23, 7  ;;  %p180_p5 = scmp.ne.s32.totalorder %s771_s16, %s767_s15 }
   0xc   : > { %s984_s25 = smov (%p35_p0, %s33_s25), 0  ;;  %s986_s26 = smov (!%p35_p0, %s37_s26), %s791_s21 }
   0xd   : > { %s158_s27 = ssub.s32 %s787_s20, %s984_s25  ;;  %p873_p3 = por %p175_p2, %p174_p1 }
   0xe   : > { %p39_p4 = scmp.ge.s32.totalorder %s986_s26, 2  ;;  %p181_p6 = scmp.eq.s32.totalorder %s606_s24, 7 }
   0xf   : > { %p609_p7 = scmp.ge.s32.totalorder %s795_s22, 1  ;;  %p235_p9 = scmp.lt.s32.totalorder %s795_s22, 9 }
  0x10   : > { %s988_s26 = smov (%p39_p4, %s986_s26), 0  ;;  %p882_p8 = por %p181_p6, %p180_p5 }
  0x11   : > { %s157_s30 = ssub.s32 %s791_s21, %s988_s26  ;;  %s164_s5 = sadd.s32 1, %s775_s17 }
  0x12   : > { %s159_s6 = sor.u32 %s158_s27, %s157_s30  ;;  %p236_p10 = pnand %p609_p7, %p235_p9 }
  0x13   : > { %p162_p11 = scmp.eq.s32.totalorder %s159_s6, 0  ;;  %p294_p12 = scmp.lt.s32.totalorder (!%p236_p10), %s783_s19, 1 }
  0x14   : > { %239 = sbr.rel (%p236_p10) target bundleno = 566 (0x236), region = 32  ;;  %p296_p13 = scmp.lt.s32.totalorder (!%p236_p10), %s779_s18, 3 }
  0x15   : > { %s891_s7 = scalar_select %p162_p11, %s775_s17, %s164_s5  }
  0x16   : > { %s974_s1 = sld [smem:[#allocation6_spill]] (!%p236_p10)  ;;  %s622_s13 = sshll.u32 (!%p236_p10), %s783_s19, 2 }
  0x17   : > { %s975_s0 = sld [smem:[#allocation5_spill]] (!%p236_p10)  ;;  %s434_s14 = sadd.s32 (!%p236_p10), %s779_s18, %s622_s13 }
  0x19   : > { %s295_s8 = scalar_select %p294_p12, %s783_s19, 1  ;;  %vm339_vm0 = vcmask 64512   ;;  %vm388_vm1 = vcmask 1043456  }
  0x1a   : > { %s297_s9 = scalar_select %p296_p13, %s779_s18, 3 }
  0x1b   : > { %s611_s10 = sshll.u32 %s295_s8, 2  ;;  %s721_s18 = scalar_lea.hbm %s969_s4, 64 }
  0x1c   : > { %s302_s11 = sadd.s32 %s611_s10, %s297_s9  ;;  %s291_s9 = sand.u32 1, %s771_s16  }
  0x1d   : > { %s897_s12 = sshll.u32 %s302_s11, 2  ;;  %s610_s10 = sshll.u32 %s291_s9, 3 }
  0x1e   : > { %s312_s23 = scalar_lea.vmem %s974_s1, %s897_s12  ;;  %s304_s30 = scalar_lea.vmem %s975_s0, %s897_s12 }
  0x1f   : > { %v337_v0 = vld [vmem:[%s312_s23] sm:$0xf]  ;;  %s320_s8 = scalar_lea.vmem %s967_s2, %s897_s12  ;;  %s293_s11 = scalar_lea.vmem [#allocation2], %s610_s10 }
  0x20   : > { %v333_v1 = vld [vmem:[%s304_s30] sm:$0xf]  ;;  %v344_v2 = vsel %vm339_vm0, %v337_v0, 0  ;;  %s623_s23 = sshll.u32 %s434_s14, 3  ;;  %s438_s5 = sshll.u32 %s293_s11, 4  ;;  %s439_s5 = int_to_ptr.vmem [resolvable:$true] %s438_s5 }
  0x21   : > { %v334_v3 = vunpack.c.l.bf16 %v333_v1  ;;  %353 = vmatpush.bf16.xpose.msra.mxu0 %v344_v2  ;;  %v338_v14 = vld [vmem:[%s320_s8] sm:$0xf]  ;;  %s436_s30 = scalar_lea.hbm %s969_s4, %s623_s23  ;;  %s420_s8 = scalar_lea.sflag [#allocation3], %s291_s9 }
  0x22   : > { %v390_v15 = vsel %vm388_vm1, %v338_v14, 0  ;;  %s440_s6 = sshll.u32 %s436_s30, 4  ;;  %s441_s6 = int_to_ptr.hbm [resolvable:$true] %s440_s6 }
  0x23   : > { %v335_v4 = vmul.f32 0.35351563, %v334_v3  ;;  %399 = vmatpush.bf16.msra.mxu1 %v390_v15  ;;  %s715_s0 = sshra.s32 %s441_s6, 4  ;;  %s716_s0 = int_to_ptr.hbm [resolvable:$true] %s715_s0 }
  0x24   : > { %s717_s10 = scalar_lea.hbm %s716_s0, 8  ;;  %p722_p4 = scmp.lt.s32.totalorder %s716_s0, %s969_s4 }
  0x25   : > { %v336_v5 = vpack.c.bf16 %v335_v4, %v335_v4  ;;  %p718_p0 = scmp.ne.s32.totalorder %s716_s0, %s717_s10  ;;  %p723_p5 = scmp.lt.s32.totalorder %s721_s18, %s717_s10 }
  0x27   : > { %p719_p1 = pnand %p718_p0, %p873_p3  ;;  %p724_p6 = por %p723_p5, %p722_p4 }
  0x28   : > { %619 = vmatmul.msk.bf16.vlgmr.msra.gmra.mxu0 %vm339_vm0, %v336_v5 }
  0x29   : > { %p720_p2 = pneg %p719_p1 }
  0x2b   : > { %p725_p7 = pnand %p724_p6, %p720_p2 }
  0xa5   : > { %v355_v6 = vpop.f32.mrf.mxu0 }
  0xa6   : > { %v359_v7 = vsel %vm339_vm0, %v355_v6, -inf }
  0xa7   : > { %360 = vmax.xlane.f32.xlu0 %v359_v7 }
  0xad   : > { %v357_v8 = vpop.f32.mrf.mxu0 }
 0x11a   : > { %v361_v9 = vpop.xlane.xlu0 %360 }
 0x11b   : > { %v362_v10 = vsub.f32 %v355_v6, %v361_v9 }
 0x11d   : > { %v363_v11 = vmul.f32 1.442695, %v362_v10 }
 0x11f   : > { %697 = vpow2.f32 %v363_v11 }
 0x125   : > { %v698_v12 = vpop.eup %697 }
 0x126   : > { %v365_v13 = vsel %vm339_vm0, %v698_v12, 0.0 }
 0x127   : > { %366 = vadd.xlane.f32.xlu0 %v365_v13 }
 0x19a   : > { %v367_v16 = vpop.xlane.xlu0 %366 }
 0x19b   : > { %699 = vrcp.f32 %v367_v16  ;;  %v379_v20 = vand.u32 2147483648, %v367_v16  ;;  %v377_v22 = vand.u32 2147483647, %v367_v16  ;;  %vm373_vm3 = vweird.f32 %v367_v16 }
 0x19d   : > { %v380_v24 = vor.u32 1.1754944e-38, %v379_v20  ;;  %vm378_vm5 = vcmp.eq.f32.partialorder %v377_v22, 8.507059e+37 }
 0x1a1   : > { %v700_v17 = vpop.eup %699 }
 0x1a2   : > { %v369_v18 = vmul.f32 %v700_v17, %v367_v16  ;;  %vm374_vm2 = vweird.f32 %v700_v17 }
 0x1a3   : > { %vm375_vm4 = vmor %vm373_vm3, %vm374_vm2 }
 0x1a4   : > { %v370_v19 = vsub.f32 1.0, %v369_v18 }
 0x1a6   : > { %v371_v21 = vmul.f32 %v700_v17, %v370_v19 }
 0x1a8   : > { %v372_v23 = vadd.f32 %v700_v17, %v371_v21 }
 0x1aa   : > { %v376_v25 = vsel %vm375_vm4, %v700_v17, %v372_v23 }
 0x1ab   : > { %v381_v26 = vsel %vm378_vm5, %v380_v24, %v376_v25 }
 0x1ac   : > { %v382_v27 = vmul.f32 %v698_v12, %v381_v26 }
 0x1ae   : > { %v384_v28 = vpack.c.bf16 %v382_v27, %v382_v27  ;;  %383 = vst.msk [vmem:[%s293_s11] sm:$0xff] %vm339_vm0, %v382_v27 }
 0x1b0   : > { %620 = vmatmul.msk.bf16.vlgmr.msra.gmra.mxu1 %vm339_vm0, %v384_v28 }
 0x1b1   : > { %728 = shalt.err (!%p725_p7)
}
 0x1b2   : > { %626 = dma.vmem_to_hbm [thread:$0]  (%p873_p3), %s439_s5, 128, %s441_s6, %s420_s8   ;;  %vm406_vm6 = vcmask 60416  }
 0x1b3   : > { %s331_s23 = scalar_lea.vmem %s968_s3, %s897_s12 }
 0x22d   : > { %v401_v29 = vpop.f32.mrf.mxu1 }
 0x22e   : > { %v405_v30 = vpack.c.bf16 %v401_v29, %v401_v29 }
 0x230   : > { %407 = vst.msk [vmem:[%s331_s23] sm:$0xf] %vm406_vm6, %v405_v30 }
 0x235   : > { %v403_v31 = vpop.f32.mrf.mxu1 }
 0x236 PF: > { %p632_p9 = scmp.ge.s32.totalorder %s795_s22, 2  ;;  %s466_s0 = sand.u32 1, %s767_s15  }
 0x237   : > { %s467_s1 = scalar_lea.sflag [#allocation3], %s466_s0 }
 0x238   : > { %p629_p10 = pnand %p632_p9, %p882_p8 }
 0x23a   : > { %p630_p11 = pneg %p629_p10 }
 0x23c   : > { %762 = dma.done.wait (%p630_p11), %s467_s1, 128  }
 0x23d   : > { %764 = vsyncadd (%p630_p11), %s467_s1, 4294967168  ;;  %s18_s22 = sadd.s32 1, %s795_s22   ;;  %s976_s15 = smov %s771_s16 }
 0x23e   : > { %p15_p3 = scmp.ge.s32.totalorder %s18_s22, 10   ;;  %s977_s16 = smov %s775_s17 }
 0x23f   : > { %s978_s17 = smov %s891_s7  ;;  %s979_s18 = smov %s787_s20 }
 0x240   : > { %s980_s19 = smov %s791_s21  ;;  %s981_s20 = smov %s984_s25 }
 0x241   : > { %s982_s21 = smov %s988_s26  ;;  %17 = sbr.rel (!%p15_p3) target bundleno = 8 (0x8), region = 85 }
 0x246   :  { %473 = vsyncpa [#allocation3], 1 }
 0x247   :  { %475 = vsyncpa [#allocation3 + $0x1], 1 }

// kernel: ts_encoder.10
= control target key start
LH: loop header
LB: loop body
LE: loop exit
PB: predicated region body
PF: predicated region fallthrough
CT: control target
= control target key end

     0   :  { %vm28_vm0 = vcmask 261120   ;;  %v198_v1 = vmov 0.0   ;;  %v199_v22 = vmov 32.0   ;;  %vm160_vm6 = vcmask 257024   ;;  %s271_s1 = inlined_call_operand.vmem [shape: bf16[32,32], index: 1, kind: input, shape index: {}]   ;;  %s272_s0 = inlined_call_operand.vmem [shape: bf16[16,32], index: 0, kind: input, shape index: {}]   ;;  %s273_s2 = inlined_call_operand.vmem [shape: f32[1,32], index: 2, kind: input, shape index: {}]   ;;  %s274_s3 = inlined_call_operand.vmem [shape: bf16[16,32], index: 3, kind: input, shape index: {}]   ;;  %s275_s4 = inlined_call_operand.vmem [shape: f32[1,32], index: 4, kind: input, shape index: {}]   ;;  %s276_s5 = inlined_call_operand.vmem [shape: f32[1,32], index: 5, kind: input, shape index: {}]   ;;  %s277_s6 = inlined_call_operand.vmem [shape: bf16[16,32], index: 6, kind: output, shape index: {}]  }
   0x1   :  { %v182_v0 = vld [vmem:[%s271_s1 + $0x8] sm:$0xff]  ;;  %29 = vst.msk [vmem:[#allocation2] sm:$0xff] %vm28_vm0, %v198_v1  ;;  %v181_v2 = vld [vmem:[%s271_s1] sm:$0xff]  ;;  %192 = vrcp.f32 %v199_v22 }
   0x2   :  { %30 = vst.msk [vmem:[#allocation2 + $0x8] sm:$0xff] %vm28_vm0, %v198_v1  ;;  %66 = vmatpush.bf16.msra.mxu0 %v182_v0  ;;  %v180_v3 = vld [vmem:[%s272_s0] sm:$0xff] }
   0x3   :  { %v184_v8 = vld [vmem:[%s274_s3] sm:$0xff]  }
   0x4   :  { %v189_v9 = vld [vmem:[%s273_s2] ss:$0 sm:$0xff]  ;;  %v185_v12 = vunpack.c.l.bf16 %v184_v8  ;;  %v186_v17 = vunpack.c.h.bf16 %v184_v8 }
   0x5   :  { %v190_v53 = vld [vmem:[%s275_s4] ss:$0 sm:$0xff] }
   0x6   :  { %67 = vmatpush.bf16.msra.mxu0 %v181_v2  ;;  %v191_v56 = vld [vmem:[%s276_s5] ss:$0 sm:$0xff] }
   0x7   :  { %v193_v23 = vpop.eup %192 }
   0x8   :  { %v31_v4 = vld [vmem:[#allocation2] sm:$0xff]  ;;  %v102_v24 = vmul.f32 32.0, %v193_v23  ;;  %vm106_vm1 = vweird.f32 %v193_v23 }
   0x9   :  { %179 = vmatmul.msk.bf16.vlgmr.msra.gmra.mxu0 %vm28_vm0, %v180_v3  ;;  %v32_v7 = vld [vmem:[#allocation2 + $0x8] sm:$0xff] }
   0xa   :  { %v103_v25 = vsub.f32 1.0, %v102_v24 }
   0xc   :  { %v104_v26 = vmul.f32 %v193_v23, %v103_v25 }
   0xe   :  { %v105_v27 = vadd.f32 %v193_v23, %v104_v26 }
  0x10   :  { %v107_v28 = vsel %vm106_vm1, %v193_v23, %v105_v27 }
  0x86   :  { %v69_v5 = vpop.f32.mrf.mxu0 }
  0x87   :  { %v74_v6 = vadd.f32 %v69_v5, %v31_v4 }
  0x89   :  { %76 = vst.msk [vmem:[#allocation2] sm:$0xff] %vm28_vm0, %v74_v6 }
  0x8e   :  { %v71_v10 = vpop.f32.mrf.mxu0 }
  0x8f   :  { %v75_v11 = vadd.f32 %v71_v10, %v32_v7 }
  0x90   :  { %v81_v13 = vld [vmem:[#allocation2] sm:$0xff] }
  0x91   :  { %77 = vst.msk [vmem:[#allocation2 + $0x8] sm:$0xff] %vm28_vm0, %v75_v11  ;;  %v87_v14 = vadd.f32 %v189_v9, %v81_v13 }
  0x93   :  { %v93_v15 = vadd.f32 %v185_v12, %v87_v14 }
  0x95   :  { %v95_v16 = vsel %vm28_vm0, %v93_v15, 0.0 }
  0x96   :  { %96 = vadd.xlane.f32.xlu0 %v95_v16 }
  0x98   :  { %v82_v18 = vld [vmem:[#allocation2 + $0x8] sm:$0xff] }
  0x99   :  { %v88_v19 = vadd.f32 %v189_v9, %v82_v18 }
  0x9b   :  { %v94_v20 = vadd.f32 %v186_v17, %v88_v19 }
  0x9d   :  { %v98_v21 = vsel %vm28_vm0, %v94_v20, 0.0 }
  0x9e   :  { %99 = vadd.xlane.f32.xlu0 %v98_v21 }
 0x109   :  { %v97_v29 = vpop.xlane.xlu0 %96 }
 0x10a   :  { %v108_v30 = vmul.f32 %v107_v28, %v97_v29 }
 0x10c   :  { %v110_v31 = vsub.f32 %v93_v15, %v108_v30 }
 0x10e   :  { %v112_v32 = vmul.f32 %v110_v31, %v110_v31 }
 0x110   :  { %v114_v33 = vsel %vm28_vm0, %v112_v32, 0.0 }
 0x111   :  { %115 = vadd.xlane.f32.xlu1 %v114_v33  ;;  %v100_v34 = vpop.xlane.xlu0 %99 }
 0x112   :  { %v109_v35 = vmul.f32 %v107_v28, %v100_v34 }
 0x114   :  { %v111_v36 = vsub.f32 %v94_v20, %v109_v35 }
 0x116   :  { %v113_v37 = vmul.f32 %v111_v36, %v111_v36 }
 0x118   :  { %v117_v38 = vsel %vm28_vm0, %v113_v37, 0.0 }
 0x119   :  { %118 = vadd.xlane.f32.xlu1 %v117_v38 }
 0x184   :  { %v116_v39 = vpop.xlane.xlu1 %115 }
 0x185   :  { %v120_v40 = vmul.f32 %v116_v39, %v107_v28 }
 0x187   :  { %v122_v41 = vadd.f32 1e-05, %v120_v40 }
 0x189   :  { %194 = vrsqrt.f32 %v122_v41  ;;  %vm130_vm3 = vweird.f32 %v122_v41 }
 0x18c   :  { %v119_v42 = vpop.xlane.xlu1 %118 }
 0x18d   :  { %v121_v43 = vmul.f32 %v119_v42, %v107_v28 }
 0x18f   :  { %v195_v44 = vpop.eup %194  ;;  %v123_v45 = vadd.f32 1e-05, %v121_v43 }
 0x190   :  { %v125_v46 = vmul.f32 %v195_v44, %v122_v41  ;;  %vm131_vm2 = vweird.f32 %v195_v44 }
 0x191   :  { %196 = vrsqrt.f32 %v123_v45  ;;  %vm132_vm4 = vmor %vm130_vm3, %vm131_vm2  ;;  %vm140_vm7 = vweird.f32 %v123_v45 }
 0x192   :  { %v126_v47 = vmul.f32 %v195_v44, %v125_v46 }
 0x194   :  { %v127_v48 = vmul.f32 0.5, %v126_v47 }
 0x196   :  { %v128_v49 = vsub.f32 1.5, %v127_v48 }
 0x197   :  { %v197_v50 = vpop.eup %196 }
 0x198   :  { %v129_v51 = vmul.f32 %v195_v44, %v128_v49  ;;  %v135_v52 = vmul.f32 %v197_v50, %v123_v45  ;;  %vm141_vm5 = vweird.f32 %v197_v50 }
 0x199   :  { %vm142_vm8 = vmor %vm140_vm7, %vm141_vm5 }
 0x19a   :  { %v133_v54 = vsel %vm132_vm4, %v195_v44, %v129_v51  ;;  %v136_v55 = vmul.f32 %v197_v50, %v135_v52 }
 0x19b   :  { %v144_v57 = vmul.f32 %v133_v54, %v110_v31 }
 0x19c   :  { %v137_v58 = vmul.f32 0.5, %v136_v55 }
 0x19d   :  { %v150_v59 = vmul.f32 %v190_v53, %v144_v57 }
 0x19e   :  { %v138_v60 = vsub.f32 1.5, %v137_v58 }
 0x19f   :  { %v156_v61 = vadd.f32 %v191_v56, %v150_v59 }
 0x1a0   :  { %v139_v62 = vmul.f32 %v197_v50, %v138_v60 }
 0x1a1   :  { %v158_v63 = vpack.c.bf16 %v156_v61, %v156_v61 }
 0x1a2   :  { %v143_v0 = vsel %vm142_vm8, %v197_v50, %v139_v62 }
 0x1a3   :  { %161 = vst.msk [vmem:[%s277_s6] sm:$0xf] %vm160_vm6, %v158_v63  ;;  %v145_v1 = vmul.f32 %v143_v0, %v111_v36 }
 0x1a5   :  { %v151_v2 = vmul.f32 %v190_v53, %v145_v1 }
 0x1a7   :  { %v157_v3 = vadd.f32 %v191_v56, %v151_v2 }
 0x1a9   :  { %v159_v4 = vpack.c.bf16 %v157_v3, %v157_v3 }
 0x1ab   :  { %162 = vst.msk [vmem:[%s277_s6 + $0x4] sm:$0xf] %vm160_vm6, %v159_v4 }

// kernel: ts_encoder.11
= control target key start
LH: loop header
LB: loop body
LE: loop exit
PB: predicated region body
PF: predicated region fallthrough
CT: control target
= control target key end

     0   :  { %vm31_vm0 = vcmask 261120   ;;  %v280_v7 = vmov 0.0   ;;  %vm116_vm1 = vcmask 523264   ;;  %v281_v34 = vmov 32.0   ;;  %s373_s1 = inlined_call_operand.vmem [shape: bf16[32,64], index: 1, kind: input, shape index: {}]   ;;  %s374_s2 = inlined_call_operand.vmem [shape: f32[1,64], index: 2, kind: input, shape index: {}]   ;;  %s375_s0 = inlined_call_operand.vmem [shape: bf16[16,32], index: 0, kind: input, shape index: {}]   ;;  %s376_s3 = inlined_call_operand.vmem [shape: bf16[64,32], index: 3, kind: input, shape index: {}]   ;;  %s377_s4 = inlined_call_operand.vmem [shape: f32[1,32], index: 4, kind: input, shape index: {}]   ;;  %s378_s5 = inlined_call_operand.vmem [shape: f32[1,32], index: 5, kind: input, shape index: {}]   ;;  %s379_s6 = inlined_call_operand.vmem [shape: f32[1,32], index: 6, kind: input, shape index: {}]   ;;  %s380_s7 = inlined_call_operand.vmem [shape: bf16[16,32], index: 7, kind: output, shape index: {}]  }
   0x1   :  { %v259_v0 = vld [vmem:[%s373_s1 + $0x8] sm:$0xff]  ;;  %v258_v1 = vld [vmem:[%s373_s1] sm:$0xff]  ;;  %v263_v3 = vld [vmem:[%s376_s3 + $0x18] sm:$0xff]  ;;  %32 = vst.msk [vmem:[#allocation2] sm:$0xff] %vm31_vm0, %v280_v7  ;;  %274 = vrcp.f32 %v281_v34  ;;  %vm220_vm7 = vcmask 257024  }
   0x2   :  { %71 = vmatpush.bf16.msra.mxu0 %v259_v0  ;;  %v257_v2 = vld [vmem:[%s375_s0] sm:$0xff]  ;;  %124 = vmatpush.bf16.msra.mxu1 %v263_v3  ;;  %v262_v4 = vld [vmem:[%s376_s3 + $0x10] sm:$0xff]  ;;  %v261_v5 = vld [vmem:[%s376_s3 + $0x8] sm:$0xff]  ;;  %33 = vst.msk [vmem:[#allocation2 + $0x8] sm:$0xff] %vm31_vm0, %v280_v7 }
   0x3   :  { %v260_v6 = vld [vmem:[%s376_s3] sm:$0xff] }
   0x4   :  { %v270_v9 = vld [vmem:[%s374_s2] ss:$0 sm:$0xff] }
   0x5   :  { %v265_v20 = vld [vmem:[%s375_s0] sm:$0xff]  }
   0x6   :  { %72 = vmatpush.bf16.msra.mxu0 %v258_v1  ;;  %125 = vmatpush.bf16.msra.mxu1 %v262_v4  ;;  %v271_v21 = vld [vmem:[%s377_s4] ss:$0 sm:$0xff]  ;;  %v266_v24 = vunpack.c.l.bf16 %v265_v20  ;;  %v267_v29 = vunpack.c.h.bf16 %v265_v20 }
   0x7   :  { %v275_v35 = vpop.eup %274  ;;  %v272_v1 = vld [vmem:[%s378_s5] ss:$0 sm:$0xff] }
   0x8   :  { %v81_v16 = vld [vmem:[#allocation2] sm:$0xff]  ;;  %v162_v36 = vmul.f32 32.0, %v275_v35  ;;  %vm166_vm2 = vweird.f32 %v275_v35 }
   0x9   :  { %239 = vmatmul.msk.bf16.vlgmr.msra.gmra.mxu0 %vm31_vm0, %v257_v2  ;;  %v82_v19 = vld [vmem:[#allocation2 + $0x8] sm:$0xff]  ;;  %v273_v4 = vld [vmem:[%s379_s6] ss:$0 sm:$0xff] }
   0xa   :  { %126 = vmatpush.bf16.msra.mxu1 %v261_v5  ;;  %v163_v37 = vsub.f32 1.0, %v162_v36 }
   0xc   :  { %v164_v38 = vmul.f32 %v275_v35, %v163_v37 }
   0xe   :  { %127 = vmatpush.bf16.msra.mxu1 %v260_v6  ;;  %v165_v39 = vadd.f32 %v275_v35, %v164_v38 }
  0x10   :  { %v167_v40 = vsel %vm166_vm2, %v275_v35, %v165_v39 }
  0x86   :  { %v74_v8 = vpop.f32.mrf.mxu0 }
  0x87   :  { %v75_v10 = vadd.f32 %v270_v9, %v74_v8 }
  0x89   :  { %v79_v13 = vmax.f32 %v75_v10, 0.0 }
  0x8e   :  { %v76_v11 = vpop.f32.mrf.mxu0 }
  0x8f   :  { %v77_v12 = vadd.f32 %v270_v9, %v76_v11 }
  0x91   :  { %v80_v14 = vmax.f32 %v77_v12, 0.0 }
  0x93   :  { %v83_v15 = vpack.c.bf16 %v80_v14, %v79_v13 }
  0x95   :  { %256 = vmatmul.msk.bf16.vlgmr.msra.gmra.mxu1 %vm116_vm1, %v83_v15 }
 0x112   :  { %v129_v17 = vpop.f32.mrf.mxu1 }
 0x113   :  { %v134_v18 = vadd.f32 %v129_v17, %v81_v16 }
 0x115   :  { %136 = vst.msk [vmem:[#allocation2] sm:$0xff] %vm31_vm0, %v134_v18 }
 0x11a   :  { %v131_v22 = vpop.f32.mrf.mxu1 }
 0x11b   :  { %v135_v23 = vadd.f32 %v131_v22, %v82_v19 }
 0x11c   :  { %v141_v25 = vld [vmem:[#allocation2] sm:$0xff] }
 0x11d   :  { %137 = vst.msk [vmem:[#allocation2 + $0x8] sm:$0xff] %vm31_vm0, %v135_v23  ;;  %v147_v26 = vadd.f32 %v271_v21, %v141_v25 }
 0x11f   :  { %v153_v27 = vadd.f32 %v266_v24, %v147_v26 }
 0x121   :  { %v155_v28 = vsel %vm31_vm0, %v153_v27, 0.0 }
 0x122   :  { %156 = vadd.xlane.f32.xlu0 %v155_v28 }
 0x124   :  { %v142_v30 = vld [vmem:[#allocation2 + $0x8] sm:$0xff] }
 0x125   :  { %v148_v31 = vadd.f32 %v271_v21, %v142_v30 }
 0x127   :  { %v154_v32 = vadd.f32 %v267_v29, %v148_v31 }
 0x129   :  { %v158_v33 = vsel %vm31_vm0, %v154_v32, 0.0 }
 0x12a   :  { %159 = vadd.xlane.f32.xlu0 %v158_v33 }
 0x195   :  { %v157_v41 = vpop.xlane.xlu0 %156 }
 0x196   :  { %v168_v42 = vmul.f32 %v167_v40, %v157_v41 }
 0x198   :  { %v170_v43 = vsub.f32 %v153_v27, %v168_v42 }
 0x19a   :  { %v172_v44 = vmul.f32 %v170_v43, %v170_v43 }
 0x19c   :  { %v174_v45 = vsel %vm31_vm0, %v172_v44, 0.0 }
 0x19d   :  { %175 = vadd.xlane.f32.xlu1 %v174_v45  ;;  %v160_v46 = vpop.xlane.xlu0 %159 }
 0x19e   :  { %v169_v47 = vmul.f32 %v167_v40, %v160_v46 }
 0x1a0   :  { %v171_v48 = vsub.f32 %v154_v32, %v169_v47 }
 0x1a2   :  { %v173_v49 = vmul.f32 %v171_v48, %v171_v48 }
 0x1a4   :  { %v177_v50 = vsel %vm31_vm0, %v173_v49, 0.0 }
 0x1a5   :  { %178 = vadd.xlane.f32.xlu1 %v177_v50 }
 0x210   :  { %v176_v51 = vpop.xlane.xlu1 %175 }
 0x211   :  { %v180_v52 = vmul.f32 %v176_v51, %v167_v40 }
 0x213   :  { %v182_v53 = vadd.f32 1e-05, %v180_v52 }
 0x215   :  { %276 = vrsqrt.f32 %v182_v53  ;;  %vm190_vm4 = vweird.f32 %v182_v53 }
 0x218   :  { %v179_v54 = vpop.xlane.xlu1 %178 }
 0x219   :  { %v181_v55 = vmul.f32 %v179_v54, %v167_v40 }
 0x21b   :  { %v277_v56 = vpop.eup %276  ;;  %v183_v57 = vadd.f32 1e-05, %v181_v55 }
 0x21c   :  { %v185_v58 = vmul.f32 %v277_v56, %v182_v53  ;;  %vm191_vm3 = vweird.f32 %v277_v56 }
 0x21d   :  { %278 = vrsqrt.f32 %v183_v57  ;;  %vm192_vm5 = vmor %vm190_vm4, %vm191_vm3  ;;  %vm200_vm8 = vweird.f32 %v183_v57 }
 0x21e   :  { %v186_v59 = vmul.f32 %v277_v56, %v185_v58 }
 0x220   :  { %v187_v60 = vmul.f32 0.5, %v186_v59 }
 0x222   :  { %v188_v61 = vsub.f32 1.5, %v187_v60 }
 0x223   :  { %v279_v62 = vpop.eup %278 }
 0x224   :  { %v189_v63 = vmul.f32 %v277_v56, %v188_v61  ;;  %v195_v0 = vmul.f32 %v279_v62, %v183_v57  ;;  %vm201_vm6 = vweird.f32 %v279_v62 }
 0x225   :  { %vm202_vm9 = vmor %vm200_vm8, %vm201_vm6 }
 0x226   :  { %v193_v2 = vsel %vm192_vm5, %v277_v56, %v189_v63  ;;  %v196_v3 = vmul.f32 %v279_v62, %v195_v0 }
 0x227   :  { %v204_v5 = vmul.f32 %v193_v2, %v170_v43 }
 0x228   :  { %v197_v6 = vmul.f32 0.5, %v196_v3 }
 0x229   :  { %v210_v7 = vmul.f32 %v272_v1, %v204_v5 }
 0x22a   :  { %v198_v8 = vsub.f32 1.5, %v197_v6 }
 0x22b   :  { %v216_v9 = vadd.f32 %v273_v4, %v210_v7 }
 0x22c   :  { %v199_v10 = vmul.f32 %v279_v62, %v198_v8 }
 0x22d   :  { %v218_v11 = vpack.c.bf16 %v216_v9, %v216_v9 }
 0x22e   :  { %v203_v12 = vsel %vm202_vm9, %v279_v62, %v199_v10 }
 0x22f   :  { %221 = vst.msk [vmem:[%s380_s7] sm:$0xf] %vm220_vm7, %v218_v11  ;;  %v205_v13 = vmul.f32 %v203_v12, %v171_v48 }
 0x231   :  { %v211_v14 = vmul.f32 %v272_v1, %v205_v13 }
 0x233   :  { %v217_v15 = vadd.f32 %v273_v4, %v211_v14 }
 0x235   :  { %v219_v16 = vpack.c.bf16 %v217_v15, %v217_v15 }
 0x237   :  { %222 = vst.msk [vmem:[%s380_s7 + $0x4] sm:$0xf] %vm220_vm7, %v219_v16 }

// kernel: ts_encoder.12
= control target key start
LH: loop header
LB: loop body
LE: loop exit
PB: predicated region body
PF: predicated region fallthrough
CT: control target
= control target key end

     0   :  { %vm19_vm0 = vcmask 785408   ;;  %v108_v1 = vmov 0.0   ;;  %vm47_vm1 = vcmask 261120   ;;  %vm83_vm2 = vcmask 781312   ;;  %s151_s1 = inlined_call_operand.vmem [shape: bf16[32,96], index: 1, kind: input, shape index: {}]   ;;  %s152_s2 = inlined_call_operand.vmem [shape: f32[1,96], index: 2, kind: input, shape index: {}]   ;;  %s153_s0 = inlined_call_operand.vmem [shape: bf16[16,32], index: 0, kind: input, shape index: {}]   ;;  %s154_s3 = inlined_call_operand.vmem [shape: bf16[16,96], index: 3, kind: output, shape index: {}]  }
   0x1   :  { %v105_v0 = vld [vmem:[%s151_s1 + $0x8] sm:$0xff]  ;;  %20 = vst.msk [vmem:[#allocation2] sm:$0xff] %vm19_vm0, %v108_v1  ;;  %v104_v2 = vld [vmem:[%s151_s1] sm:$0xff] }
   0x2   :  { %21 = vst.msk [vmem:[#allocation2 + $0x8] sm:$0xff] %vm19_vm0, %v108_v1  ;;  %57 = vmatpush.bf16.msra.mxu0 %v105_v0  ;;  %v103_v3 = vld [vmem:[%s153_s0] sm:$0xff] }
   0x3   :  { %v107_v8 = vld [vmem:[%s152_s2] ss:$0 sm:$0xff] }
   0x6   :  { %58 = vmatpush.bf16.msra.mxu0 %v104_v2 }
   0x8   :  { %v22_v4 = vld [vmem:[#allocation2] sm:$0xff] }
   0x9   :  { %102 = vmatmul.msk.bf16.vlgmr.msra.gmra.mxu0 %vm47_vm1, %v103_v3  ;;  %v23_v7 = vld [vmem:[#allocation2 + $0x8] sm:$0xff] }
  0x86   :  { %v60_v5 = vpop.f32.mrf.mxu0 }
  0x87   :  { %v65_v6 = vadd.f32 %v60_v5, %v22_v4 }
  0x89   :  { %68 = vst.msk [vmem:[#allocation2] sm:$0xff] %vm19_vm0, %v65_v6 }
  0x8e   :  { %v62_v9 = vpop.f32.mrf.mxu0 }
  0x8f   :  { %v66_v10 = vadd.f32 %v62_v9, %v23_v7 }
  0x90   :  { %v73_v11 = vld [vmem:[#allocation2] sm:$0xff] }
  0x91   :  { %v79_v12 = vadd.f32 %v107_v8, %v73_v11  ;;  %69 = vst.msk [vmem:[#allocation2 + $0x8] sm:$0xff] %vm19_vm0, %v66_v10 }
  0x93   :  { %v81_v13 = vpack.c.bf16 %v79_v12, %v79_v12 }
  0x95   :  { %84 = vst.msk [vmem:[%s154_s3] sm:$0xf] %vm83_vm2, %v81_v13 }
  0x98   :  { %v74_v14 = vld [vmem:[#allocation2 + $0x8] sm:$0xff] }
  0x99   :  { %v80_v15 = vadd.f32 %v107_v8, %v74_v14 }
  0x9b   :  { %v82_v16 = vpack.c.bf16 %v80_v15, %v80_v15 }
  0x9d   :  { %85 = vst.msk [vmem:[%s154_s3 + $0x4] sm:$0xf] %vm83_vm2, %v82_v16 }

// kernel: ts_encoder.15
= control target key start
LH: loop header
LB: loop body
LE: loop exit
PB: predicated region body
PF: predicated region fallthrough
CT: control target
= control target key end

     0   :  { %s417_s0 = inlined_call_operand.vmem [shape: bf16[16,32], index: 0, kind: input, shape index: {}]   ;;  %s418_s1 = inlined_call_operand.vmem [shape: bf16[32,64], index: 1, kind: input, shape index: {}]   ;;  %s419_s2 = inlined_call_operand.vmem [shape: f32[1,64], index: 2, kind: input, shape index: {}]   ;;  %s420_s3 = inlined_call_operand.vmem [shape: bf16[64,32], index: 3, kind: input, shape index: {}]   ;;  %s421_s4 = inlined_call_operand.vmem [shape: f32[1,32], index: 4, kind: input, shape index: {}]   ;;  %s422_s5 = inlined_call_operand.vmem [shape: f32[1,32], index: 5, kind: input, shape index: {}]   ;;  %s423_s6 = inlined_call_operand.vmem [shape: f32[1,32], index: 6, kind: input, shape index: {}]   ;;  %s424_s7 = inlined_call_operand.hbm [shape: bf16[16,32], index: 7, kind: output, shape index: {}]  }
   0x1   :  { %v274_v0 = vld [vmem:[%s418_s1 + $0x8] sm:$0xff]  ;;  %v273_v1 = vld [vmem:[%s418_s1] sm:$0xff] }
   0x2   :  { %72 = vmatpush.bf16.msra.mxu0 %v274_v0 }
   0x3   :  { %12 = vsyncpa [#allocation4], 0  ;;  %v272_v2 = vld [vmem:[%s417_s0] sm:$0xff]  ;;  %vm32_vm0 = vcmask 261120   ;;  %v278_v3 = vld [vmem:[%s420_s3 + $0x18] sm:$0xff]  ;;  %v324_v7 = vmov 0.0  }
   0x4   :  { %125 = vmatpush.bf16.msra.mxu1 %v278_v3  ;;  %v277_v4 = vld [vmem:[%s420_s3 + $0x10] sm:$0xff]  ;;  %v276_v5 = vld [vmem:[%s420_s3 + $0x8] sm:$0xff]  ;;  %v275_v6 = vld [vmem:[%s420_s3] sm:$0xff]  ;;  %33 = vst.msk [vmem:[#allocation2] sm:$0xff] %vm32_vm0, %v324_v7  ;;  %vm117_vm1 = vcmask 523264   ;;  %v325_v34 = vmov 32.0  }
   0x5   :  { %34 = vst.msk [vmem:[#allocation2 + $0x8] sm:$0xff] %vm32_vm0, %v324_v7  ;;  %v288_v9 = vld [vmem:[%s419_s2] ss:$0 sm:$0xff]  ;;  %292 = vrcp.f32 %v325_v34  ;;  %vm221_vm8 = vcmask 257024   ;;  %s327_s23 = smov 64   ;;  %s328_s24 = smov 4  }
   0x6   :  { %73 = vmatpush.bf16.msra.mxu0 %v273_v1  ;;  %v280_v20 = vld [vmem:[%s417_s0] sm:$0xff]  }
   0x7   :  { %v289_v21 = vld [vmem:[%s421_s4] ss:$0 sm:$0xff]  ;;  %v281_v24 = vunpack.c.l.bf16 %v280_v20  ;;  %v282_v29 = vunpack.c.h.bf16 %v280_v20 }
   0x8   :  { %126 = vmatpush.bf16.msra.mxu1 %v277_v4  ;;  %v290_v1 = vld [vmem:[%s422_s5] ss:$0 sm:$0xff]  ;;  %s326_s5 = smov [#allocation3]  }
   0x9   :  { %254 = vmatmul.msk.bf16.vlgmr.msra.gmra.mxu0 %vm32_vm0, %v272_v2  ;;  %v291_v4 = vld [vmem:[%s423_s6] ss:$0 sm:$0xff]  ;;  %s228_s20 = sshll.u32 %s326_s5, 4  ;;  %s230_s6 = sshll.u32 %s424_s7, 4  ;;  %s229_s20 = int_to_ptr.vmem [resolvable:$true] %s228_s20  ;;  %s231_s6 = int_to_ptr.hbm [resolvable:$true] %s230_s6 }
   0xb   :  { %v82_v16 = vld [vmem:[#allocation2] sm:$0xff]  ;;  %v293_v35 = vpop.eup %292 }
   0xc   :  { %127 = vmatpush.bf16.msra.mxu1 %v276_v5  ;;  %v83_v19 = vld [vmem:[#allocation2 + $0x8] sm:$0xff]  ;;  %v163_v36 = vmul.f32 32.0, %v293_v35  ;;  %vm167_vm2 = vweird.f32 %v293_v35 }
   0xe   :  { %v164_v37 = vsub.f32 1.0, %v163_v36 }
  0x10   :  { %128 = vmatpush.bf16.msra.mxu1 %v275_v6  ;;  %v165_v38 = vmul.f32 %v293_v35, %v164_v37 }
  0x12   :  { %v166_v39 = vadd.f32 %v293_v35, %v165_v38 }
  0x14   :  { %v168_v40 = vsel %vm167_vm2, %v293_v35, %v166_v39 }
  0x86   :  { %v75_v8 = vpop.f32.mrf.mxu0 }
  0x87   :  { %v76_v10 = vadd.f32 %v288_v9, %v75_v8 }
  0x89   :  { %v80_v13 = vmax.f32 %v76_v10, 0.0 }
  0x8e   :  { %v77_v11 = vpop.f32.mrf.mxu0 }
  0x8f   :  { %v78_v12 = vadd.f32 %v288_v9, %v77_v11 }
  0x91   :  { %v81_v14 = vmax.f32 %v78_v12, 0.0 }
  0x93   :  { %v84_v15 = vpack.c.bf16 %v81_v14, %v80_v13 }
  0x95   :  { %271 = vmatmul.msk.bf16.vlgmr.msra.gmra.mxu1 %vm117_vm1, %v84_v15 }
 0x112   :  { %v130_v17 = vpop.f32.mrf.mxu1 }
 0x113   :  { %v135_v18 = vadd.f32 %v130_v17, %v82_v16 }
 0x115   :  { %137 = vst.msk [vmem:[#allocation2] sm:$0xff] %vm32_vm0, %v135_v18 }
 0x11a   :  { %v132_v22 = vpop.f32.mrf.mxu1 }
 0x11b   :  { %v136_v23 = vadd.f32 %v132_v22, %v83_v19 }
 0x11c   :  { %v142_v25 = vld [vmem:[#allocation2] sm:$0xff] }
 0x11d   :  { %138 = vst.msk [vmem:[#allocation2 + $0x8] sm:$0xff] %vm32_vm0, %v136_v23  ;;  %v148_v26 = vadd.f32 %v289_v21, %v142_v25 }
 0x11f   :  { %v154_v27 = vadd.f32 %v281_v24, %v148_v26 }
 0x121   :  { %v156_v28 = vsel %vm32_vm0, %v154_v27, 0.0 }
 0x122   :  { %157 = vadd.xlane.f32.xlu0 %v156_v28 }
 0x124   :  { %v143_v30 = vld [vmem:[#allocation2 + $0x8] sm:$0xff] }
 0x125   :  { %v149_v31 = vadd.f32 %v289_v21, %v143_v30 }
 0x127   :  { %v155_v32 = vadd.f32 %v282_v29, %v149_v31 }
 0x129   :  { %v159_v33 = vsel %vm32_vm0, %v155_v32, 0.0 }
 0x12a   :  { %160 = vadd.xlane.f32.xlu0 %v159_v33 }
 0x195   :  { %v158_v41 = vpop.xlane.xlu0 %157 }
 0x196   :  { %v169_v42 = vmul.f32 %v168_v40, %v158_v41 }
 0x198   :  { %v171_v43 = vsub.f32 %v154_v27, %v169_v42 }
 0x19a   :  { %v173_v44 = vmul.f32 %v171_v43, %v171_v43 }
 0x19c   :  { %v175_v45 = vsel %vm32_vm0, %v173_v44, 0.0 }
 0x19d   :  { %176 = vadd.xlane.f32.xlu1 %v175_v45  ;;  %v161_v46 = vpop.xlane.xlu0 %160 }
 0x19e   :  { %v170_v47 = vmul.f32 %v168_v40, %v161_v46 }
 0x1a0   :  { %v172_v48 = vsub.f32 %v155_v32, %v170_v47 }
 0x1a2   :  { %v174_v49 = vmul.f32 %v172_v48, %v172_v48 }
 0x1a4   :  { %v178_v50 = vsel %vm32_vm0, %v174_v49, 0.0 }
 0x1a5   :  { %179 = vadd.xlane.f32.xlu1 %v178_v50 }
 0x210   :  { %v177_v51 = vpop.xlane.xlu1 %176 }
 0x211   :  { %v181_v52 = vmul.f32 %v177_v51, %v168_v40 }
 0x213   :  { %v183_v53 = vadd.f32 1e-05, %v181_v52 }
 0x215   :  { %294 = vrsqrt.f32 %v183_v53  ;;  %vm191_vm4 = vweird.f32 %v183_v53 }
 0x218   :  { %v180_v54 = vpop.xlane.xlu1 %179 }
 0x219   :  { %v182_v55 = vmul.f32 %v180_v54, %v168_v40 }
 0x21b   :  { %v295_v56 = vpop.eup %294  ;;  %v184_v57 = vadd.f32 1e-05, %v182_v55 }
 0x21c   :  { %v186_v58 = vmul.f32 %v295_v56, %v183_v53  ;;  %vm192_vm3 = vweird.f32 %v295_v56 }
 0x21d   :  { %296 = vrsqrt.f32 %v184_v57  ;;  %vm193_vm5 = vmor %vm191_vm4, %vm192_vm3  ;;  %vm201_vm7 = vweird.f32 %v184_v57 }
 0x21e   :  { %v187_v59 = vmul.f32 %v295_v56, %v186_v58 }
 0x220   :  { %v188_v60 = vmul.f32 0.5, %v187_v59 }
 0x222   :  { %v189_v61 = vsub.f32 1.5, %v188_v60 }
 0x223   :  { %v297_v62 = vpop.eup %296 }
 0x224   :  { %v190_v63 = vmul.f32 %v295_v56, %v189_v61  ;;  %v196_v0 = vmul.f32 %v297_v62, %v184_v57  ;;  %vm202_vm6 = vweird.f32 %v297_v62 }
 0x225   :  { %vm203_vm9 = vmor %vm201_vm7, %vm202_vm6 }
 0x226   :  { %v194_v2 = vsel %vm193_vm5, %v295_v56, %v190_v63  ;;  %v197_v3 = vmul.f32 %v297_v62, %v196_v0 }
 0x227   :  { %v205_v5 = vmul.f32 %v194_v2, %v171_v43 }
 0x228   :  { %v198_v6 = vmul.f32 0.5, %v197_v3 }
 0x229   :  { %v211_v7 = vmul.f32 %v290_v1, %v205_v5 }
 0x22a   :  { %v199_v8 = vsub.f32 1.5, %v198_v6 }
 0x22b   :  { %v217_v9 = vadd.f32 %v291_v4, %v211_v7 }
 0x22c   :  { %v200_v10 = vmul.f32 %v297_v62, %v199_v8 }
 0x22d   :  { %v219_v11 = vpack.c.bf16 %v217_v9, %v217_v9 }
 0x22e   :  { %v204_v12 = vsel %vm203_vm9, %v297_v62, %v200_v10 }
 0x22f   :  { %v206_v13 = vmul.f32 %v204_v12, %v172_v48  ;;  %222 = vst.msk [vmem:[#allocation3] sm:$0xf] %vm221_vm8, %v219_v11 }
 0x231   :  { %v212_v14 = vmul.f32 %v290_v1, %v206_v13 }
 0x233   :  { %v218_v15 = vadd.f32 %v291_v4, %v212_v14 }
 0x235   :  { %v220_v16 = vpack.c.bf16 %v218_v15, %v218_v15 }
 0x237   :  { %223 = vst.msk [vmem:[#allocation3 + $0x4] sm:$0xf] %vm221_vm8, %v220_v16 }
 0x238   :  { %236 = dma.vmem_to_hbm [thread:$0]  %s229_s20, 128, %s231_s6, [#allocation4], %s327_s23, %s327_s23, %s328_s24  }
 0x239   :  { %322 = dma.done.wait [#allocation4], 128  }
 0x23a   :  { %323 = vsyncadd [#allocation4], 4294967168 }
 0x23b   :  { %241 = vsyncpa [#allocation4], 1 }

</bundles_post_ra>
